<compile_context>
chip_gen: v7x
topology: tpu7x:2x2x1
jax: 0.10.0
libtpu: 0.0.40
codegen_flags: <defaults>
</compile_context>

<pallas_src>
import math
import jax
import jax.numpy as jnp
from jax import lax
from jax.experimental import pallas as pl
from jax.experimental.pallas import tpu as pltpu

# ---------------- synthetic mini-BERT config ----------------
B = 2            # batch
S = 8            # sequence length
H = 32           # hidden size
NH = 2           # attention heads
DH = H // NH     # head dim
F = 4 * H        # FFN intermediate size
L = 2            # number of encoder layers
V = 64           # vocab size
N_CLASSES = 4    # classifier classes
LANE = 128       # TPU lane width (packed slabs / classifier output use this)
BS = B * S
EPS = 1e-12
SCALE = 1.0 / math.sqrt(DH)

# per-layer small-parameter slab row layout (lane-width LANE, f32)
_ROW_BQKV, _ROW_BO, _ROW_LN1G, _ROW_LN1B, _ROW_B1, _ROW_B2, _ROW_LN2G, _ROW_LN2B = range(8)
_LSLAB_ROWS = 8
# global small-parameter slab row layout
_GROW_PPT0 = 0              # rows [0, BS): pos + token-type embedding, first H lanes
_GROW_EMB_G = BS            # embedding LayerNorm gamma, first H lanes
_GROW_EMB_B = BS + 1        # embedding LayerNorm beta,  first H lanes
_GROW_CLS_B = BS + 2        # classifier bias (lane-padded to LANE)
_GSLAB_ROWS = BS + 3


# ---------------- in-kernel helpers (f32 math) ----------------
def _layer_norm(x, g, b):
    mu = jnp.mean(x, axis=-1, keepdims=True)
    var = jnp.mean((x - mu) ** 2, axis=-1, keepdims=True)
    return (x - mu) * lax.rsqrt(var + EPS) * g + b


def _gelu(x):
    # tanh approximation of GELU (BERT-style)
    return 0.5 * x * (1.0 + jnp.tanh(0.7978845608028654 * (x + 0.044715 * x * x * x)))


def _softmax(x):
    m = jnp.max(x, axis=-1, keepdims=True)
    e = jnp.exp(x - m)
    return e * pl.reciprocal(jnp.sum(e, axis=-1, keepdims=True), approx=True)


# ---------------- fused kernel: one grid step == one encoder layer ----------------
def fused_forward_kernel(ids_sref,                       # scalar-prefetch: (BS,) int32 in SMEM
                         mask_ref, wemb_ref, gslab_ref,  # shared inputs
                         wqkv_ref, wo_ref, w1_ref, w2_ref, lslab_ref,  # per-layer (blocked on L)
                         clsw_ref,                       # classifier weight (H, LANE) bf16
                         out_ref,                        # (B, LANE) f32
                         hidden_sc):                     # VMEM scratch (BS, H) f32, carried over L
    f32 = jnp.float32
    bf16 = jnp.bfloat16
    l = pl.program_id(0)

    # ---- layer 0 only: exact row-gather embedding lookup + (pos+type) add + LayerNorm ----
    @pl.when(l == 0)
    def _():
        for i in range(BS):   # BS=16, fully unrolled; ids come from SMEM (scalar prefetch)
            hidden_sc[pl.ds(i, 1), :] = wemb_ref[pl.ds(ids_sref[i], 1), :]
        emb = hidden_sc[...] + gslab_ref[_GROW_PPT0:_GROW_PPT0 + BS, :H]
        hidden_sc[...] = _layer_norm(emb,
                                     gslab_ref[_GROW_EMB_G:_GROW_EMB_G + 1, :H],
                                     gslab_ref[_GROW_EMB_B:_GROW_EMB_B + 1, :H])

    # ---- per-layer small params sliced from one packed slab (static offsets) ----
    sl = lslab_ref[0]                                   # (8, LANE) f32
    b_qkv = sl[_ROW_BQKV:_ROW_BQKV + 1, :3 * H]
    bo = sl[_ROW_BO:_ROW_BO + 1, :H]
    ln1g = sl[_ROW_LN1G:_ROW_LN1G + 1, :H]
    ln1b = sl[_ROW_LN1B:_ROW_LN1B + 1, :H]
    b1 = sl[_ROW_B1:_ROW_B1 + 1, :F]
    b2 = sl[_ROW_B2:_ROW_B2 + 1, :H]
    ln2g = sl[_ROW_LN2G:_ROW_LN2G + 1, :H]
    ln2b = sl[_ROW_LN2B:_ROW_LN2B + 1, :H]

    hidden = hidden_sc[...]                             # (BS, H) f32
    xb = hidden.astype(bf16)

    # ---- fused QKV projection: one (BS,H)@(H,3H) MXU matmul ----
    qkv = jnp.dot(xb, wqkv_ref[0], preferred_element_type=f32) + b_qkv     # (BS, 3H) f32
    q = (qkv[:, 0 * H:1 * H] * SCALE).astype(bf16)
    k = qkv[:, 1 * H:2 * H].astype(bf16)
    v = qkv[:, 2 * H:3 * H].astype(bf16)

    # ---- heads folded into one batch axis (B*NH): reshape+transpose, no concats ----
    def to_heads(x):
        return x.reshape(B, S, NH, DH).transpose(0, 2, 1, 3).reshape(B * NH, S, DH)

    qh, kh, vh = to_heads(q), to_heads(k), to_heads(v)

    # additive attention mask, broadcast without materializing a concat
    neg = (1.0 - mask_ref[...]) * (-1e9)                                    # (B, S)
    neg_bh = jnp.broadcast_to(neg[:, None, :], (B, NH, S)).reshape(B * NH, 1, S)

    s = jnp.einsum('bqd,bkd->bqk', qh, kh, preferred_element_type=f32) + neg_bh
    p = _softmax(s)                                                         # f32 stats
    ctx = jnp.einsum('bqk,bkd->bqd', p.astype(bf16), vh, preferred_element_type=f32)
    ctx2d = ctx.reshape(B, NH, S, DH).transpose(0, 2, 1, 3).reshape(BS, H)  # concat-free merge

    attn = jnp.dot(ctx2d.astype(bf16), wo_ref[0], preferred_element_type=f32) + bo
    # dropout inside BERT is identity at inference
    h1 = _layer_norm(hidden + attn, ln1g, ln1b)

    ff = _gelu(jnp.dot(h1.astype(bf16), w1_ref[0], preferred_element_type=f32) + b1)
    ff = jnp.dot(ff.astype(bf16), w2_ref[0], preferred_element_type=f32) + b2
    hidden_sc[...] = _layer_norm(h1 + ff, ln2g, ln2b)

    # ---- last layer only: [CLS] pooling + dropout(0.3)->identity (eval) + classifier ----
    @pl.when(l == L - 1)
    def _():
        cls = hidden_sc[pl.ds(0, B, stride=S), :]       # strided row select: rows 0, S, ...
        out_ref[...] = (jnp.dot(cls.astype(bf16), clsw_ref[...],
                                preferred_element_type=f32)
                        + gslab_ref[_GROW_CLS_B:_GROW_CLS_B + 1, :])


# ---------------- wrapper: ONE pallas_call, grid over encoder layers ----------------
def skill_extractor_forward(params, input_ids, attention_mask):
    ids = input_ids.reshape(BS).astype(jnp.int32)       # scalar-prefetched to SMEM
    mask = attention_mask.astype(jnp.float32)           # (B, S)

    grid_spec = pltpu.PrefetchScalarGridSpec(
        num_scalar_prefetch=1,
        grid=(L,),
        in_specs=[
            pl.BlockSpec((B, S), lambda l, ids: (0, 0)),              # mask (shared)
            pl.BlockSpec((V, H), lambda l, ids: (0, 0)),              # word embedding table
            pl.BlockSpec((_GSLAB_ROWS, LANE), lambda l, ids: (0, 0)), # global small-param slab
            pl.BlockSpec((1, H, 3 * H), lambda l, ids: (l, 0, 0)),    # W_qkv  [L,H,3H] bf16
            pl.BlockSpec((1, H, H), lambda l, ids: (l, 0, 0)),        # W_o    [L,H,H]  bf16
            pl.BlockSpec((1, H, F), lambda l, ids: (l, 0, 0)),        # W_ffn1 [L,H,F]  bf16
            pl.BlockSpec((1, F, H), lambda l, ids: (l, 0, 0)),        # W_ffn2 [L,F,H]  bf16
            pl.BlockSpec((1, _LSLAB_ROWS, LANE), lambda l, ids: (l, 0, 0)),  # per-layer slab
            pl.BlockSpec((H, LANE), lambda l, ids: (0, 0)),           # classifier weight
        ],
        out_specs=pl.BlockSpec((B, LANE), lambda l, ids: (0, 0)),
        scratch_shapes=[pltpu.VMEM((BS, H), jnp.float32)],            # carried activation
    )

    logits_padded = pl.pallas_call(
        fused_forward_kernel,
        out_shape=jax.ShapeDtypeStruct((B, LANE), jnp.float32),       # lane-dense output slab
        grid_spec=grid_spec,
        compiler_params=pltpu.CompilerParams(
            dimension_semantics=("arbitrary",),                       # L is a carried dependency
            vmem_limit_bytes=32 * 1024 * 1024),
    )(ids, mask,
      params['word_emb'], params['gslab'],
      params['w_qkv'], params['wo'], params['w1'], params['w2'],
      params['lslab'], params['cls_w'])

    return logits_padded[:, :N_CLASSES]


# ---------------- deterministic parameter construction (stacked / packed layout) ----------------
def make_params(key):
    ks = iter(jax.random.split(key, 32))

    def nrm(shape, scale=0.02):
        return (scale * jax.random.normal(next(ks), shape)).astype(jnp.float32)

    word_emb = nrm((V, H))
    pos_emb = nrm((S, H))
    type_emb = nrm((2, H))

    # global small-param slab (BS+3, LANE) f32
    gslab = jnp.zeros((_GSLAB_ROWS, LANE), jnp.float32)
    gslab = gslab.at[_GROW_PPT0:_GROW_PPT0 + BS, :H].set(
        jnp.tile(pos_emb + type_emb[0:1], (B, 1)))        # token_type_ids are all zero
    gslab = gslab.at[_GROW_EMB_G, :H].set(jnp.ones((H,), jnp.float32))
    gslab = gslab.at[_GROW_EMB_B, :H].set(jnp.zeros((H,), jnp.float32))
    gslab = gslab.at[_GROW_CLS_B, :N_CLASSES].set(nrm((N_CLASSES,)))

    # per-layer weight stacks (MXU operands in bf16)
    w_qkv = jnp.stack([jnp.concatenate([nrm((H, H)), nrm((H, H)), nrm((H, H))], axis=-1)
                       for _ in range(L)])                 # (L, H, 3H)
    wo = jnp.stack([nrm((H, H)) for _ in range(L)])        # (L, H, H)
    w1 = jnp.stack([nrm((H, F)) for _ in range(L)])        # (L, H, F)
    w2 = jnp.stack([nrm((F, H)) for _ in range(L)])        # (L, F, H)

    # per-layer small-param slab (L, 8, LANE) f32
    lslab_layers = []
    for _ in range(L):
        slab = jnp.zeros((_LSLAB_ROWS, LANE), jnp.float32)
        slab = slab.at[_ROW_BQKV, :3 * H].set(nrm((3 * H,)))
        slab = slab.at[_ROW_BO, :H].set(nrm((H,)))
        slab = slab.at[_ROW_LN1G, :H].set(jnp.ones((H,), jnp.float32))
        slab = slab.at[_ROW_LN1B, :H].set(jnp.zeros((H,), jnp.float32))
        slab = slab.at[_ROW_B1, :F].set(nrm((F,)))
        slab = slab.at[_ROW_B2, :H].set(nrm((H,)))
        slab = slab.at[_ROW_LN2G, :H].set(jnp.ones((H,), jnp.float32))
        slab = slab.at[_ROW_LN2B, :H].set(jnp.zeros((H,), jnp.float32))
        lslab_layers.append(slab)
    lslab = jnp.stack(lslab_layers)                        # (L, 8, LANE)

    cls_w = nrm((H, N_CLASSES))
    cls_w_pad = jnp.zeros((H, LANE), jnp.float32).at[:, :N_CLASSES].set(cls_w)

    return {
        'word_emb': word_emb,                              # f32, gathered by row (exact)
        'gslab': gslab,
        'w_qkv': w_qkv.astype(jnp.bfloat16),
        'wo': wo.astype(jnp.bfloat16),
        'w1': w1.astype(jnp.bfloat16),
        'w2': w2.astype(jnp.bfloat16),
        'lslab': lslab,
        'cls_w': cls_w_pad.astype(jnp.bfloat16),
    }


if __name__ == "__main__":
    key = jax.random.PRNGKey(0)
    kp, ki = jax.random.split(key)

    params = make_params(kp)
    input_ids = jax.random.randint(ki, (B, S), 0, V, dtype=jnp.int32)
    attention_mask = jnp.array(
        [[1.0] * S,
         [1.0] * (S - 2) + [0.0, 0.0]], dtype=jnp.float32)   # batch 1 has 2 padded tokens

    fwd = jax.jit(lambda ids, m: skill_extractor_forward(params, ids, m))
    logits = fwd(input_ids, attention_mask)
    jax.block_until_ready(logits)

    assert logits.shape == (B, N_CLASSES)
    assert bool(jnp.all(jnp.isfinite(logits)))
    print("KERNEL_OK")
</pallas_src>

<mosaic_0001>
module attributes {stable_mosaic.version = 11 : i64} {
  func.func @fused_forward_kernel(%arg0: i32, %arg1: memref<16xi32, #tpu.memory_space<smem>>, %arg2: memref<2x8xf32, #tpu.memory_space<vmem>>, %arg3: memref<64x32xf32, #tpu.memory_space<vmem>>, %arg4: memref<19x128xf32, #tpu.memory_space<vmem>>, %arg5: memref<1x32x96xbf16, #tpu.memory_space<vmem>>, %arg6: memref<1x32x32xbf16, #tpu.memory_space<vmem>>, %arg7: memref<1x32x128xbf16, #tpu.memory_space<vmem>>, %arg8: memref<1x128x32xbf16, #tpu.memory_space<vmem>>, %arg9: memref<1x8x128xf32, #tpu.memory_space<vmem>>, %arg10: memref<32x128xbf16, #tpu.memory_space<vmem>>, %arg11: memref<2x128xf32, #tpu.memory_space<vmem>>, %arg12: memref<16x32xf32, #tpu.memory_space<vmem>>) attributes {dimension_semantics = [#tpu.dimension_semantics<arbitrary>], iteration_bounds = array<i64: 2>, scalar_prefetch = 1 : i64, scratch_operands = 1 : i64, tpu.core_type = #tpu.core_type<tc>, window_params = [{pipeline_mode = #tpu.pipeline_mode<synchronous>, transform_indices = @transform_0, window_bounds = array<i64: 2, 8>}, {pipeline_mode = #tpu.pipeline_mode<synchronous>, transform_indices = @transform_1, window_bounds = array<i64: 64, 32>}, {pipeline_mode = #tpu.pipeline_mode<synchronous>, transform_indices = @transform_2, window_bounds = array<i64: 19, 128>}, {transform_indices = @transform_3, window_bounds = array<i64: 1, 32, 96>}, {transform_indices = @transform_4, window_bounds = array<i64: 1, 32, 32>}, {transform_indices = @transform_5, window_bounds = array<i64: 1, 32, 128>}, {transform_indices = @transform_6, window_bounds = array<i64: 1, 128, 32>}, {transform_indices = @transform_7, window_bounds = array<i64: 1, 8, 128>}, {pipeline_mode = #tpu.pipeline_mode<synchronous>, transform_indices = @transform_8, window_bounds = array<i64: 32, 128>}, {pipeline_mode = #tpu.pipeline_mode<synchronous>, transform_indices = @transform_9, window_bounds = array<i64: 2, 128>}]} {
    %c0_i32 = arith.constant 0 : i32
    %0 = arith.cmpi eq, %arg0, %c0_i32 : i32
    %1 = arith.extui %0 : i1 to i32
    %c0_i32_0 = arith.constant 0 : i32
    %2 = arith.cmpi ne, %1, %c0_i32_0 : i32
    scf.if %2 {
      %c0_46 = arith.constant 0 : index
      %145 = memref.load %arg1[%c0_46] : memref<16xi32, #tpu.memory_space<smem>>
      %146 = arith.index_cast %145 : i32 to index
      %c0_47 = arith.constant 0 : index
      %147 = vector.load %arg3[%146, %c0_47] : memref<64x32xf32, #tpu.memory_space<vmem>>, vector<1x32xf32>
      %c0_48 = arith.constant 0 : index
      %c0_49 = arith.constant 0 : index
      %148 = vector.load %arg12[%c0_48, %c0_49] : memref<16x32xf32, #tpu.memory_space<vmem>>, vector<1x32xf32>
      tpu.vector_store %arg12[%c0_48, %c0_49], %147 {strides = array<i32>} : memref<16x32xf32, #tpu.memory_space<vmem>>, vector<1x32xf32>,
      %c1 = arith.constant 1 : index
      %149 = memref.load %arg1[%c1] : memref<16xi32, #tpu.memory_space<smem>>
      %150 = arith.index_cast %149 : i32 to index
      %c0_50 = arith.constant 0 : index
      %151 = vector.load %arg3[%150, %c0_50] : memref<64x32xf32, #tpu.memory_space<vmem>>, vector<1x32xf32>
      %c1_51 = arith.constant 1 : index
      %c0_52 = arith.constant 0 : index
      %152 = vector.load %arg12[%c1_51, %c0_52] : memref<16x32xf32, #tpu.memory_space<vmem>>, vector<1x32xf32>
      tpu.vector_store %arg12[%c1_51, %c0_52], %151 {strides = array<i32>} : memref<16x32xf32, #tpu.memory_space<vmem>>, vector<1x32xf32>,
      %c2 = arith.constant 2 : index
      %153 = memref.load %arg1[%c2] : memref<16xi32, #tpu.memory_space<smem>>
      %154 = arith.index_cast %153 : i32 to index
      %c0_53 = arith.constant 0 : index
      %155 = vector.load %arg3[%154, %c0_53] : memref<64x32xf32, #tpu.memory_space<vmem>>, vector<1x32xf32>
      %c2_54 = arith.constant 2 : index
      %c0_55 = arith.constant 0 : index
      %156 = vector.load %arg12[%c2_54, %c0_55] : memref<16x32xf32, #tpu.memory_space<vmem>>, vector<1x32xf32>
      tpu.vector_store %arg12[%c2_54, %c0_55], %155 {strides = array<i32>} : memref<16x32xf32, #tpu.memory_space<vmem>>, vector<1x32xf32>,
      %c3 = arith.constant 3 : index
      %157 = memref.load %arg1[%c3] : memref<16xi32, #tpu.memory_space<smem>>
      %158 = arith.index_cast %157 : i32 to index
      %c0_56 = arith.constant 0 : index
      %159 = vector.load %arg3[%158, %c0_56] : memref<64x32xf32, #tpu.memory_space<vmem>>, vector<1x32xf32>
      %c3_57 = arith.constant 3 : index
      %c0_58 = arith.constant 0 : index
      %160 = vector.load %arg12[%c3_57, %c0_58] : memref<16x32xf32, #tpu.memory_space<vmem>>, vector<1x32xf32>
      tpu.vector_store %arg12[%c3_57, %c0_58], %159 {strides = array<i32>} : memref<16x32xf32, #tpu.memory_space<vmem>>, vector<1x32xf32>,
      %c4 = arith.constant 4 : index
      %161 = memref.load %arg1[%c4] : memref<16xi32, #tpu.memory_space<smem>>
      %162 = arith.index_cast %161 : i32 to index
      %c0_59 = arith.constant 0 : index
      %163 = vector.load %arg3[%162, %c0_59] : memref<64x32xf32, #tpu.memory_space<vmem>>, vector<1x32xf32>
      %c4_60 = arith.constant 4 : index
      %c0_61 = arith.constant 0 : index
      %164 = vector.load %arg12[%c4_60, %c0_61] : memref<16x32xf32, #tpu.memory_space<vmem>>, vector<1x32xf32>
      tpu.vector_store %arg12[%c4_60, %c0_61], %163 {strides = array<i32>} : memref<16x32xf32, #tpu.memory_space<vmem>>, vector<1x32xf32>,
      %c5 = arith.constant 5 : index
      %165 = memref.load %arg1[%c5] : memref<16xi32, #tpu.memory_space<smem>>
      %166 = arith.index_cast %165 : i32 to index
      %c0_62 = arith.constant 0 : index
      %167 = vector.load %arg3[%166, %c0_62] : memref<64x32xf32, #tpu.memory_space<vmem>>, vector<1x32xf32>
      %c5_63 = arith.constant 5 : index
      %c0_64 = arith.constant 0 : index
      %168 = vector.load %arg12[%c5_63, %c0_64] : memref<16x32xf32, #tpu.memory_space<vmem>>, vector<1x32xf32>
      tpu.vector_store %arg12[%c5_63, %c0_64], %167 {strides = array<i32>} : memref<16x32xf32, #tpu.memory_space<vmem>>, vector<1x32xf32>,
      %c6 = arith.constant 6 : index
      %169 = memref.load %arg1[%c6] : memref<16xi32, #tpu.memory_space<smem>>
      %170 = arith.index_cast %169 : i32 to index
      %c0_65 = arith.constant 0 : index
      %171 = vector.load %arg3[%170, %c0_65] : memref<64x32xf32, #tpu.memory_space<vmem>>, vector<1x32xf32>
      %c6_66 = arith.constant 6 : index
      %c0_67 = arith.constant 0 : index
      %172 = vector.load %arg12[%c6_66, %c0_67] : memref<16x32xf32, #tpu.memory_space<vmem>>, vector<1x32xf32>
      tpu.vector_store %arg12[%c6_66, %c0_67], %171 {strides = array<i32>} : memref<16x32xf32, #tpu.memory_space<vmem>>, vector<1x32xf32>,
      %c7 = arith.constant 7 : index
      %173 = memref.load %arg1[%c7] : memref<16xi32, #tpu.memory_space<smem>>
      %174 = arith.index_cast %173 : i32 to index
      %c0_68 = arith.constant 0 : index
      %175 = vector.load %arg3[%174, %c0_68] : memref<64x32xf32, #tpu.memory_space<vmem>>, vector<1x32xf32>
      %c7_69 = arith.constant 7 : index
      %c0_70 = arith.constant 0 : index
      %176 = vector.load %arg12[%c7_69, %c0_70] : memref<16x32xf32, #tpu.memory_space<vmem>>, vector<1x32xf32>
      tpu.vector_store %arg12[%c7_69, %c0_70], %175 {strides = array<i32>} : memref<16x32xf32, #tpu.memory_space<vmem>>, vector<1x32xf32>,
      %c8 = arith.constant 8 : index
      %177 = memref.load %arg1[%c8] : memref<16xi32, #tpu.memory_space<smem>>
      %178 = arith.index_cast %177 : i32 to index
      %c0_71 = arith.constant 0 : index
      %179 = vector.load %arg3[%178, %c0_71] : memref<64x32xf32, #tpu.memory_space<vmem>>, vector<1x32xf32>
      %c8_72 = arith.constant 8 : index
      %c0_73 = arith.constant 0 : index
      %180 = vector.load %arg12[%c8_72, %c0_73] : memref<16x32xf32, #tpu.memory_space<vmem>>, vector<1x32xf32>
      tpu.vector_store %arg12[%c8_72, %c0_73], %179 {strides = array<i32>} : memref<16x32xf32, #tpu.memory_space<vmem>>, vector<1x32xf32>,
      %c9 = arith.constant 9 : index
      %181 = memref.load %arg1[%c9] : memref<16xi32, #tpu.memory_space<smem>>
      %182 = arith.index_cast %181 : i32 to index
      %c0_74 = arith.constant 0 : index
      %183 = vector.load %arg3[%182, %c0_74] : memref<64x32xf32, #tpu.memory_space<vmem>>, vector<1x32xf32>
      %c9_75 = arith.constant 9 : index
      %c0_76 = arith.constant 0 : index
      %184 = vector.load %arg12[%c9_75, %c0_76] : memref<16x32xf32, #tpu.memory_space<vmem>>, vector<1x32xf32>
      tpu.vector_store %arg12[%c9_75, %c0_76], %183 {strides = array<i32>} : memref<16x32xf32, #tpu.memory_space<vmem>>, vector<1x32xf32>,
      %c10 = arith.constant 10 : index
      %185 = memref.load %arg1[%c10] : memref<16xi32, #tpu.memory_space<smem>>
      %186 = arith.index_cast %185 : i32 to index
      %c0_77 = arith.constant 0 : index
      %187 = vector.load %arg3[%186, %c0_77] : memref<64x32xf32, #tpu.memory_space<vmem>>, vector<1x32xf32>
      %c10_78 = arith.constant 10 : index
      %c0_79 = arith.constant 0 : index
      %188 = vector.load %arg12[%c10_78, %c0_79] : memref<16x32xf32, #tpu.memory_space<vmem>>, vector<1x32xf32>
      tpu.vector_store %arg12[%c10_78, %c0_79], %187 {strides = array<i32>} : memref<16x32xf32, #tpu.memory_space<vmem>>, vector<1x32xf32>,
      %c11 = arith.constant 11 : index
      %189 = memref.load %arg1[%c11] : memref<16xi32, #tpu.memory_space<smem>>
      %190 = arith.index_cast %189 : i32 to index
      %c0_80 = arith.constant 0 : index
      %191 = vector.load %arg3[%190, %c0_80] : memref<64x32xf32, #tpu.memory_space<vmem>>, vector<1x32xf32>
      %c11_81 = arith.constant 11 : index
      %c0_82 = arith.constant 0 : index
      %192 = vector.load %arg12[%c11_81, %c0_82] : memref<16x32xf32, #tpu.memory_space<vmem>>, vector<1x32xf32>
      tpu.vector_store %arg12[%c11_81, %c0_82], %191 {strides = array<i32>} : memref<16x32xf32, #tpu.memory_space<vmem>>, vector<1x32xf32>,
      %c12 = arith.constant 12 : index
      %193 = memref.load %arg1[%c12] : memref<16xi32, #tpu.memory_space<smem>>
      %194 = arith.index_cast %193 : i32 to index
      %c0_83 = arith.constant 0 : index
      %195 = vector.load %arg3[%194, %c0_83] : memref<64x32xf32, #tpu.memory_space<vmem>>, vector<1x32xf32>
      %c12_84 = arith.constant 12 : index
      %c0_85 = arith.constant 0 : index
      %196 = vector.load %arg12[%c12_84, %c0_85] : memref<16x32xf32, #tpu.memory_space<vmem>>, vector<1x32xf32>
      tpu.vector_store %arg12[%c12_84, %c0_85], %195 {strides = array<i32>} : memref<16x32xf32, #tpu.memory_space<vmem>>, vector<1x32xf32>,
      %c13 = arith.constant 13 : index
      %197 = memref.load %arg1[%c13] : memref<16xi32, #tpu.memory_space<smem>>
      %198 = arith.index_cast %197 : i32 to index
      %c0_86 = arith.constant 0 : index
      %199 = vector.load %arg3[%198, %c0_86] : memref<64x32xf32, #tpu.memory_space<vmem>>, vector<1x32xf32>
      %c13_87 = arith.constant 13 : index
      %c0_88 = arith.constant 0 : index
      %200 = vector.load %arg12[%c13_87, %c0_88] : memref<16x32xf32, #tpu.memory_space<vmem>>, vector<1x32xf32>
      tpu.vector_store %arg12[%c13_87, %c0_88], %199 {strides = array<i32>} : memref<16x32xf32, #tpu.memory_space<vmem>>, vector<1x32xf32>,
      %c14 = arith.constant 14 : index
      %201 = memref.load %arg1[%c14] : memref<16xi32, #tpu.memory_space<smem>>
      %202 = arith.index_cast %201 : i32 to index
      %c0_89 = arith.constant 0 : index
      %203 = vector.load %arg3[%202, %c0_89] : memref<64x32xf32, #tpu.memory_space<vmem>>, vector<1x32xf32>
      %c14_90 = arith.constant 14 : index
      %c0_91 = arith.constant 0 : index
      %204 = vector.load %arg12[%c14_90, %c0_91] : memref<16x32xf32, #tpu.memory_space<vmem>>, vector<1x32xf32>
      tpu.vector_store %arg12[%c14_90, %c0_91], %203 {strides = array<i32>} : memref<16x32xf32, #tpu.memory_space<vmem>>, vector<1x32xf32>,
      %c15 = arith.constant 15 : index
      %205 = memref.load %arg1[%c15] : memref<16xi32, #tpu.memory_space<smem>>
      %206 = arith.index_cast %205 : i32 to index
      %c0_92 = arith.constant 0 : index
      %207 = vector.load %arg3[%206, %c0_92] : memref<64x32xf32, #tpu.memory_space<vmem>>, vector<1x32xf32>
      %c15_93 = arith.constant 15 : index
      %c0_94 = arith.constant 0 : index
      %208 = vector.load %arg12[%c15_93, %c0_94] : memref<16x32xf32, #tpu.memory_space<vmem>>, vector<1x32xf32>
      tpu.vector_store %arg12[%c15_93, %c0_94], %207 {strides = array<i32>} : memref<16x32xf32, #tpu.memory_space<vmem>>, vector<1x32xf32>,
      %c0_95 = arith.constant 0 : index
      %c0_96 = arith.constant 0 : index
      %209 = vector.load %arg12[%c0_95, %c0_96] : memref<16x32xf32, #tpu.memory_space<vmem>>, vector<16x32xf32>
      %c0_97 = arith.constant 0 : index
      %c0_98 = arith.constant 0 : index
      %210 = vector.load %arg4[%c0_97, %c0_98] : memref<19x128xf32, #tpu.memory_space<vmem>>, vector<16x32xf32>
      %211 = arith.addf %209, %210 : vector<16x32xf32>
      %c16 = arith.constant 16 : index
      %c0_99 = arith.constant 0 : index
      %212 = vector.load %arg4[%c16, %c0_99] : memref<19x128xf32, #tpu.memory_space<vmem>>, vector<1x32xf32>
      %c17 = arith.constant 17 : index
      %c0_100 = arith.constant 0 : index
      %213 = vector.load %arg4[%c17, %c0_100] : memref<19x128xf32, #tpu.memory_space<vmem>>, vector<1x32xf32>
      %cst_101 = arith.constant dense<0.000000e+00> : vector<16xf32>
      %214 = vector.multi_reduction <add>, %211, %cst_101 [1] : vector<16x32xf32> to vector<16xf32>
      %215 = vector.shape_cast %214 : vector<16xf32> to vector<16x1xf32>
      %cst_102 = arith.constant 3.200000e+01 : f32
      %216 = vector.broadcast %cst_102 : f32 to vector<16x1xf32>
      %217 = arith.divf %215, %216 : vector<16x1xf32>
      %218 = vector.broadcast %217 : vector<16x1xf32> to vector<16x32xf32>
      %219 = arith.subf %211, %218 : vector<16x32xf32>
      %220 = arith.mulf %219, %219 : vector<16x32xf32>
      %cst_103 = arith.constant dense<0.000000e+00> : vector<16xf32>
      %221 = vector.multi_reduction <add>, %220, %cst_103 [1] : vector<16x32xf32> to vector<16xf32>
      %222 = vector.shape_cast %221 : vector<16xf32> to vector<16x1xf32>
      %cst_104 = arith.constant 3.200000e+01 : f32
      %223 = vector.broadcast %cst_104 : f32 to vector<16x1xf32>
      %224 = arith.divf %222, %223 : vector<16x1xf32>
      %225 = vector.broadcast %217 : vector<16x1xf32> to vector<16x32xf32>
      %226 = arith.subf %211, %225 : vector<16x32xf32>
      %cst_105 = arith.constant 9.99999996E-13 : f32
      %227 = vector.broadcast %cst_105 : f32 to vector<16x1xf32>
      %228 = arith.addf %224, %227 : vector<16x1xf32>
      %229 = math.rsqrt %228 : vector<16x1xf32>
      %230 = vector.broadcast %229 : vector<16x1xf32> to vector<16x32xf32>
      %231 = arith.mulf %226, %230 : vector<16x32xf32>
      %232 = vector.broadcast %212 : vector<1x32xf32> to vector<16x32xf32>
      %233 = arith.mulf %231, %232 : vector<16x32xf32>
      %234 = vector.broadcast %213 : vector<1x32xf32> to vector<16x32xf32>
      %235 = arith.addf %233, %234 : vector<16x32xf32>
      %c0_106 = arith.constant 0 : index
      %c0_107 = arith.constant 0 : index
      %236 = vector.load %arg12[%c0_106, %c0_107] : memref<16x32xf32, #tpu.memory_space<vmem>>, vector<16x32xf32>
      tpu.vector_store %arg12[%c0_106, %c0_107], %235 {strides = array<i32>} : memref<16x32xf32, #tpu.memory_space<vmem>>, vector<16x32xf32>,
    } else {
    }
    %c0 = arith.constant 0 : index
    %c0_1 = arith.constant 0 : index
    %c0_2 = arith.constant 0 : index
    %3 = vector.load %arg9[%c0, %c0_1, %c0_2] : memref<1x8x128xf32, #tpu.memory_space<vmem>>, vector<1x8x128xf32>
    %4 = vector.shape_cast %3 : vector<1x8x128xf32> to vector<8x128xf32>
    %5 = vector.extract_strided_slice %4 {offsets = [0, 0], sizes = [1, 96], strides = [1, 1]} : vector<8x128xf32> to vector<1x96xf32>
    %6 = vector.extract_strided_slice %4 {offsets = [1, 0], sizes = [1, 32], strides = [1, 1]} : vector<8x128xf32> to vector<1x32xf32>
    %7 = vector.extract_strided_slice %4 {offsets = [2, 0], sizes = [1, 32], strides = [1, 1]} : vector<8x128xf32> to vector<1x32xf32>
    %8 = vector.extract_strided_slice %4 {offsets = [3, 0], sizes = [1, 32], strides = [1, 1]} : vector<8x128xf32> to vector<1x32xf32>
    %9 = vector.extract_strided_slice %4 {offsets = [4, 0], sizes = [1, 128], strides = [1, 1]} : vector<8x128xf32> to vector<1x128xf32>
    %10 = vector.extract_strided_slice %4 {offsets = [5, 0], sizes = [1, 32], strides = [1, 1]} : vector<8x128xf32> to vector<1x32xf32>
    %11 = vector.extract_strided_slice %4 {offsets = [6, 0], sizes = [1, 32], strides = [1, 1]} : vector<8x128xf32> to vector<1x32xf32>
    %12 = vector.extract_strided_slice %4 {offsets = [7, 0], sizes = [1, 32], strides = [1, 1]} : vector<8x128xf32> to vector<1x32xf32>
    %c0_3 = arith.constant 0 : index
    %c0_4 = arith.constant 0 : index
    %13 = vector.load %arg12[%c0_3, %c0_4] : memref<16x32xf32, #tpu.memory_space<vmem>>, vector<16x32xf32>
    %14 = arith.truncf %13 : vector<16x32xf32> to vector<16x32xbf16>
    %c0_5 = arith.constant 0 : index
    %c0_6 = arith.constant 0 : index
    %c0_7 = arith.constant 0 : index
    %15 = vector.load %arg5[%c0_5, %c0_6, %c0_7] : memref<1x32x96xbf16, #tpu.memory_space<vmem>>, vector<1x32x96xbf16>
    %16 = vector.shape_cast %15 : vector<1x32x96xbf16> to vector<32x96xbf16>
    %cst = arith.constant dense<0.000000e+00> : vector<16x96xf32>
    %17 = tpu.matmul %14, %16, %cst {dimension_numbers = #tpu.dot_dimension_numbers<[1], [0], [0], [1], [0, 0, 1, 1], [], []>} : vector<16x32xbf16>, vector<32x96xbf16>, vector<16x96xf32> -> vector<16x96xf32>
    %18 = vector.broadcast %5 : vector<1x96xf32> to vector<16x96xf32>
    %19 = arith.addf %17, %18 : vector<16x96xf32>
    %20 = vector.extract_strided_slice %19 {offsets = [0, 0], sizes = [16, 32], strides = [1, 1]} : vector<16x96xf32> to vector<16x32xf32>
    %cst_8 = arith.constant 2.500000e-01 : f32
    %21 = vector.broadcast %cst_8 : f32 to vector<16x32xf32>
    %22 = arith.mulf %20, %21 : vector<16x32xf32>
    %23 = arith.truncf %22 : vector<16x32xf32> to vector<16x32xbf16>
    %24 = vector.extract_strided_slice %19 {offsets = [0, 32], sizes = [16, 32], strides = [1, 1]} : vector<16x96xf32> to vector<16x32xf32>
    %25 = arith.truncf %24 : vector<16x32xf32> to vector<16x32xbf16>
    %26 = vector.extract_strided_slice %19 {offsets = [0, 64], sizes = [16, 32], strides = [1, 1]} : vector<16x96xf32> to vector<16x32xf32>
    %27 = arith.truncf %26 : vector<16x32xf32> to vector<16x32xbf16>
    %28 = vector.shape_cast %23 : vector<16x32xbf16> to vector<2x8x2x16xbf16>
    %29 = tpu.transpose %28, [0, 2, 1, 3] : vector<2x8x2x16xbf16> -> vector<2x2x8x16xbf16>
    %30 = vector.shape_cast %29 : vector<2x2x8x16xbf16> to vector<4x8x16xbf16>
    %31 = vector.shape_cast %25 : vector<16x32xbf16> to vector<2x8x2x16xbf16>
    %32 = tpu.transpose %31, [0, 2, 1, 3] : vector<2x8x2x16xbf16> -> vector<2x2x8x16xbf16>
    %33 = vector.shape_cast %32 : vector<2x2x8x16xbf16> to vector<4x8x16xbf16>
    %34 = vector.shape_cast %27 : vector<16x32xbf16> to vector<2x8x2x16xbf16>
    %35 = tpu.transpose %34, [0, 2, 1, 3] : vector<2x8x2x16xbf16> -> vector<2x2x8x16xbf16>
    %36 = vector.shape_cast %35 : vector<2x2x8x16xbf16> to vector<4x8x16xbf16>
    %c0_9 = arith.constant 0 : index
    %c0_10 = arith.constant 0 : index
    %37 = vector.load %arg2[%c0_9, %c0_10] : memref<2x8xf32, #tpu.memory_space<vmem>>, vector<2x8xf32>
    %cst_11 = arith.constant 1.000000e+00 : f32
    %38 = vector.broadcast %cst_11 : f32 to vector<2x8xf32>
    %39 = arith.subf %38, %37 : vector<2x8xf32>
    %cst_12 = arith.constant -1.000000e+09 : f32
    %40 = vector.broadcast %cst_12 : f32 to vector<2x8xf32>
    %41 = arith.mulf %39, %40 : vector<2x8xf32>
    %42 = vector.shape_cast %41 : vector<2x8xf32> to vector<2x1x8xf32>
    %43 = vector.shape_cast %42 : vector<2x1x8xf32> to vector<2x1x8xf32>
    %44 = vector.broadcast %43 : vector<2x1x8xf32> to vector<2x2x8xf32>
    %45 = vector.shape_cast %44 : vector<2x2x8xf32> to vector<4x1x8xf32>
    "tpu.trace_start"() <{level = 10 : i32, message = "bqd,bkd->bqk"}> : () -> ()
    %cst_13 = arith.constant dense<0.000000e+00> : vector<4x8x8xf32>
    %46 = tpu.matmul %30, %33, %cst_13 {dimension_numbers = #tpu.dot_dimension_numbers<[2], [2], [1], [1], [0, 0, 0, 1, 1, 1], [0], [0]>} : vector<4x8x16xbf16>, vector<4x8x16xbf16>, vector<4x8x8xf32> -> vector<4x8x8xf32>
    "tpu.trace_stop"() : () -> ()
    %47 = vector.broadcast %45 : vector<4x1x8xf32> to vector<4x8x8xf32>
    %48 = arith.addf %46, %47 : vector<4x8x8xf32>
    %cst_14 = arith.constant dense<0xFF800000> : vector<4x8xf32>
    %49 = vector.multi_reduction <maximumf>, %48, %cst_14 [2] : vector<4x8x8xf32> to vector<4x8xf32>
    %50 = vector.shape_cast %49 : vector<4x8xf32> to vector<4x8x1xf32>
    %51 = vector.broadcast %50 : vector<4x8x1xf32> to vector<4x8x8xf32>
    %52 = arith.subf %48, %51 : vector<4x8x8xf32>
    %53 = math.exp %52 : vector<4x8x8xf32>
    %cst_15 = arith.constant dense<0.000000e+00> : vector<4x8xf32>
    %54 = vector.multi_reduction <add>, %53, %cst_15 [2] : vector<4x8x8xf32> to vector<4x8xf32>
    %55 = vector.shape_cast %54 : vector<4x8xf32> to vector<4x8x1xf32>
    %56 = tpu.reciprocal %55 {approx = true} : vector<4x8x1xf32> -> vector<4x8x1xf32>
    %57 = vector.broadcast %56 : vector<4x8x1xf32> to vector<4x8x8xf32>
    %58 = arith.mulf %53, %57 : vector<4x8x8xf32>
    %59 = arith.truncf %58 : vector<4x8x8xf32> to vector<4x8x8xbf16>
    "tpu.trace_start"() <{level = 10 : i32, message = "bqk,bkd->bqd"}> : () -> ()
    %cst_16 = arith.constant dense<0.000000e+00> : vector<4x8x16xf32>
    %60 = tpu.matmul %59, %36, %cst_16 {dimension_numbers = #tpu.dot_dimension_numbers<[2], [1], [1], [2], [0, 0, 0, 1, 1, 2], [0], [0]>} : vector<4x8x8xbf16>, vector<4x8x16xbf16>, vector<4x8x16xf32> -> vector<4x8x16xf32>
    "tpu.trace_stop"() : () -> ()
    %61 = vector.shape_cast %60 : vector<4x8x16xf32> to vector<2x2x8x16xf32>
    %62 = tpu.transpose %61, [0, 2, 1, 3] : vector<2x2x8x16xf32> -> vector<2x8x2x16xf32>
    %63 = vector.shape_cast %62 : vector<2x8x2x16xf32> to vector<16x32xf32>
    %64 = arith.truncf %63 : vector<16x32xf32> to vector<16x32xbf16>
    %c0_17 = arith.constant 0 : index
    %c0_18 = arith.constant 0 : index
    %c0_19 = arith.constant 0 : index
    %65 = vector.load %arg6[%c0_17, %c0_18, %c0_19] : memref<1x32x32xbf16, #tpu.memory_space<vmem>>, vector<1x32x32xbf16>
    %66 = vector.shape_cast %65 : vector<1x32x32xbf16> to vector<32x32xbf16>
    %cst_20 = arith.constant dense<0.000000e+00> : vector<16x32xf32>
    %67 = tpu.matmul %64, %66, %cst_20 {dimension_numbers = #tpu.dot_dimension_numbers<[1], [0], [0], [1], [0, 0, 1, 1], [], []>} : vector<16x32xbf16>, vector<32x32xbf16>, vector<16x32xf32> -> vector<16x32xf32>
    %68 = vector.broadcast %6 : vector<1x32xf32> to vector<16x32xf32>
    %69 = arith.addf %67, %68 : vector<16x32xf32>
    %70 = arith.addf %13, %69 : vector<16x32xf32>
    %cst_21 = arith.constant dense<0.000000e+00> : vector<16xf32>
    %71 = vector.multi_reduction <add>, %70, %cst_21 [1] : vector<16x32xf32> to vector<16xf32>
    %72 = vector.shape_cast %71 : vector<16xf32> to vector<16x1xf32>
    %cst_22 = arith.constant 3.200000e+01 : f32
    %73 = vector.broadcast %cst_22 : f32 to vector<16x1xf32>
    %74 = arith.divf %72, %73 : vector<16x1xf32>
    %75 = vector.broadcast %74 : vector<16x1xf32> to vector<16x32xf32>
    %76 = arith.subf %70, %75 : vector<16x32xf32>
    %77 = arith.mulf %76, %76 : vector<16x32xf32>
    %cst_23 = arith.constant dense<0.000000e+00> : vector<16xf32>
    %78 = vector.multi_reduction <add>, %77, %cst_23 [1] : vector<16x32xf32> to vector<16xf32>
    %79 = vector.shape_cast %78 : vector<16xf32> to vector<16x1xf32>
    %cst_24 = arith.constant 3.200000e+01 : f32
    %80 = vector.broadcast %cst_24 : f32 to vector<16x1xf32>
    %81 = arith.divf %79, %80 : vector<16x1xf32>
    %82 = vector.broadcast %74 : vector<16x1xf32> to vector<16x32xf32>
    %83 = arith.subf %70, %82 : vector<16x32xf32>
    %cst_25 = arith.constant 9.99999996E-13 : f32
    %84 = vector.broadcast %cst_25 : f32 to vector<16x1xf32>
    %85 = arith.addf %81, %84 : vector<16x1xf32>
    %86 = math.rsqrt %85 : vector<16x1xf32>
    %87 = vector.broadcast %86 : vector<16x1xf32> to vector<16x32xf32>
    %88 = arith.mulf %83, %87 : vector<16x32xf32>
    %89 = vector.broadcast %7 : vector<1x32xf32> to vector<16x32xf32>
    %90 = arith.mulf %88, %89 : vector<16x32xf32>
    %91 = vector.broadcast %8 : vector<1x32xf32> to vector<16x32xf32>
    %92 = arith.addf %90, %91 : vector<16x32xf32>
    %93 = arith.truncf %92 : vector<16x32xf32> to vector<16x32xbf16>
    %c0_26 = arith.constant 0 : index
    %c0_27 = arith.constant 0 : index
    %c0_28 = arith.constant 0 : index
    %94 = vector.load %arg7[%c0_26, %c0_27, %c0_28] : memref<1x32x128xbf16, #tpu.memory_space<vmem>>, vector<1x32x128xbf16>
    %95 = vector.shape_cast %94 : vector<1x32x128xbf16> to vector<32x128xbf16>
    %cst_29 = arith.constant dense<0.000000e+00> : vector<16x128xf32>
    %96 = tpu.matmul %93, %95, %cst_29 {dimension_numbers = #tpu.dot_dimension_numbers<[1], [0], [0], [1], [0, 0, 1, 1], [], []>} : vector<16x32xbf16>, vector<32x128xbf16>, vector<16x128xf32> -> vector<16x128xf32>
    %97 = vector.broadcast %9 : vector<1x128xf32> to vector<16x128xf32>
    %98 = arith.addf %96, %97 : vector<16x128xf32>
    %cst_30 = arith.constant 5.000000e-01 : f32
    %99 = vector.broadcast %cst_30 : f32 to vector<16x128xf32>
    %100 = arith.mulf %99, %98 : vector<16x128xf32>
    %cst_31 = arith.constant 4.471500e-02 : f32
    %101 = vector.broadcast %cst_31 : f32 to vector<16x128xf32>
    %102 = arith.mulf %101, %98 : vector<16x128xf32>
    %103 = arith.mulf %102, %98 : vector<16x128xf32>
    %104 = arith.mulf %103, %98 : vector<16x128xf32>
    %105 = arith.addf %98, %104 : vector<16x128xf32>
    %cst_32 = arith.constant 0.797884583 : f32
    %106 = vector.broadcast %cst_32 : f32 to vector<16x128xf32>
    %107 = arith.mulf %106, %105 : vector<16x128xf32>
    %108 = math.tanh %107 : vector<16x128xf32>
    %cst_33 = arith.constant 1.000000e+00 : f32
    %109 = vector.broadcast %cst_33 : f32 to vector<16x128xf32>
    %110 = arith.addf %109, %108 : vector<16x128xf32>
    %111 = arith.mulf %100, %110 : vector<16x128xf32>
    %112 = arith.truncf %111 : vector<16x128xf32> to vector<16x128xbf16>
    %c0_34 = arith.constant 0 : index
    %c0_35 = arith.constant 0 : index
    %c0_36 = arith.constant 0 : index
    %113 = vector.load %arg8[%c0_34, %c0_35, %c0_36] : memref<1x128x32xbf16, #tpu.memory_space<vmem>>, vector<1x128x32xbf16>
    %114 = vector.shape_cast %113 : vector<1x128x32xbf16> to vector<128x32xbf16>
    %cst_37 = arith.constant dense<0.000000e+00> : vector<16x32xf32>
    %115 = tpu.matmul %112, %114, %cst_37 {dimension_numbers = #tpu.dot_dimension_numbers<[1], [0], [0], [1], [0, 0, 1, 1], [], []>} : vector<16x128xbf16>, vector<128x32xbf16>, vector<16x32xf32> -> vector<16x32xf32>
    %116 = vector.broadcast %10 : vector<1x32xf32> to vector<16x32xf32>
    %117 = arith.addf %115, %116 : vector<16x32xf32>
    %118 = arith.addf %92, %117 : vector<16x32xf32>
    %cst_38 = arith.constant dense<0.000000e+00> : vector<16xf32>
    %119 = vector.multi_reduction <add>, %118, %cst_38 [1] : vector<16x32xf32> to vector<16xf32>
    %120 = vector.shape_cast %119 : vector<16xf32> to vector<16x1xf32>
    %cst_39 = arith.constant 3.200000e+01 : f32
    %121 = vector.broadcast %cst_39 : f32 to vector<16x1xf32>
    %122 = arith.divf %120, %121 : vector<16x1xf32>
    %123 = vector.broadcast %122 : vector<16x1xf32> to vector<16x32xf32>
    %124 = arith.subf %118, %123 : vector<16x32xf32>
    %125 = arith.mulf %124, %124 : vector<16x32xf32>
    %cst_40 = arith.constant dense<0.000000e+00> : vector<16xf32>
    %126 = vector.multi_reduction <add>, %125, %cst_40 [1] : vector<16x32xf32> to vector<16xf32>
    %127 = vector.shape_cast %126 : vector<16xf32> to vector<16x1xf32>
    %cst_41 = arith.constant 3.200000e+01 : f32
    %128 = vector.broadcast %cst_41 : f32 to vector<16x1xf32>
    %129 = arith.divf %127, %128 : vector<16x1xf32>
    %130 = vector.broadcast %122 : vector<16x1xf32> to vector<16x32xf32>
    %131 = arith.subf %118, %130 : vector<16x32xf32>
    %cst_42 = arith.constant 9.99999996E-13 : f32
    %132 = vector.broadcast %cst_42 : f32 to vector<16x1xf32>
    %133 = arith.addf %129, %132 : vector<16x1xf32>
    %134 = math.rsqrt %133 : vector<16x1xf32>
    %135 = vector.broadcast %134 : vector<16x1xf32> to vector<16x32xf32>
    %136 = arith.mulf %131, %135 : vector<16x32xf32>
    %137 = vector.broadcast %11 : vector<1x32xf32> to vector<16x32xf32>
    %138 = arith.mulf %136, %137 : vector<16x32xf32>
    %139 = vector.broadcast %12 : vector<1x32xf32> to vector<16x32xf32>
    %140 = arith.addf %138, %139 : vector<16x32xf32>
    %c0_43 = arith.constant 0 : index
    %c0_44 = arith.constant 0 : index
    %141 = vector.load %arg12[%c0_43, %c0_44] : memref<16x32xf32, #tpu.memory_space<vmem>>, vector<16x32xf32>
    tpu.vector_store %arg12[%c0_43, %c0_44], %140 {strides = array<i32>} : memref<16x32xf32, #tpu.memory_space<vmem>>, vector<16x32xf32>,
    %c1_i32 = arith.constant 1 : i32
    %142 = arith.cmpi eq, %arg0, %c1_i32 : i32
    %143 = arith.extui %142 : i1 to i32
    %c0_i32_45 = arith.constant 0 : i32
    %144 = arith.cmpi ne, %143, %c0_i32_45 : i32
    scf.if %144 {
      %c0_46 = arith.constant 0 : index
      %c0_47 = arith.constant 0 : index
      %145 = tpu.strided_load %arg12[%c0_46, %c0_47] {strides = array<i32: 8, 1>} : memref<16x32xf32, #tpu.memory_space<vmem>>, vector<2x32xf32>
      %146 = arith.truncf %145 : vector<2x32xf32> to vector<2x32xbf16>
      %c0_48 = arith.constant 0 : index
      %c0_49 = arith.constant 0 : index
      %147 = vector.load %arg10[%c0_48, %c0_49] : memref<32x128xbf16, #tpu.memory_space<vmem>>, vector<32x128xbf16>
      %cst_50 = arith.constant dense<0.000000e+00> : vector<2x128xf32>
      %148 = tpu.matmul %146, %147, %cst_50 {dimension_numbers = #tpu.dot_dimension_numbers<[1], [0], [0], [1], [0, 0, 1, 1], [], []>} : vector<2x32xbf16>, vector<32x128xbf16>, vector<2x128xf32> -> vector<2x128xf32>
      %c18 = arith.constant 18 : index
      %c0_51 = arith.constant 0 : index
      %149 = vector.load %arg4[%c18, %c0_51] : memref<19x128xf32, #tpu.memory_space<vmem>>, vector<1x128xf32>
      %150 = vector.broadcast %149 : vector<1x128xf32> to vector<2x128xf32>
      %151 = arith.addf %148, %150 : vector<2x128xf32>
      %c0_52 = arith.constant 0 : index
      %c0_53 = arith.constant 0 : index
      %152 = vector.load %arg11[%c0_52, %c0_53] : memref<2x128xf32, #tpu.memory_space<vmem>>, vector<2x128xf32>
      tpu.vector_store %arg11[%c0_52, %c0_53], %151 {strides = array<i32>} : memref<2x128xf32, #tpu.memory_space<vmem>>, vector<2x128xf32>,
    } else {
    }
    return
  }
  func.func @transform_0(%arg0: i32, %arg1: memref<16xi32, #tpu.memory_space<smem>>) -> (i32, i32) {
    %c0_i32 = arith.constant 0 : i32
    %c0_i32_0 = arith.constant 0 : i32
    %c0_i32_1 = arith.constant 0 : i32
    return %c0_i32, %c0_i32_0 : i32, i32
  }
  func.func @transform_1(%arg0: i32, %arg1: memref<16xi32, #tpu.memory_space<smem>>) -> (i32, i32) {
    %c0_i32 = arith.constant 0 : i32
    %c0_i32_0 = arith.constant 0 : i32
    %c0_i32_1 = arith.constant 0 : i32
    return %c0_i32, %c0_i32_0 : i32, i32
  }
  func.func @transform_2(%arg0: i32, %arg1: memref<16xi32, #tpu.memory_space<smem>>) -> (i32, i32) {
    %c0_i32 = arith.constant 0 : i32
    %c0_i32_0 = arith.constant 0 : i32
    %c0_i32_1 = arith.constant 0 : i32
    return %c0_i32, %c0_i32_0 : i32, i32
  }
  func.func @transform_3(%arg0: i32, %arg1: memref<16xi32, #tpu.memory_space<smem>>) -> (i32, i32, i32) {
    %c0_i32 = arith.constant 0 : i32
    %c0_i32_0 = arith.constant 0 : i32
    %c0_i32_1 = arith.constant 0 : i32
    return %arg0, %c0_i32, %c0_i32_0 : i32, i32, i32
  }
  func.func @transform_4(%arg0: i32, %arg1: memref<16xi32, #tpu.memory_space<smem>>) -> (i32, i32, i32) {
    %c0_i32 = arith.constant 0 : i32
    %c0_i32_0 = arith.constant 0 : i32
    %c0_i32_1 = arith.constant 0 : i32
    return %arg0, %c0_i32, %c0_i32_0 : i32, i32, i32
  }
  func.func @transform_5(%arg0: i32, %arg1: memref<16xi32, #tpu.memory_space<smem>>) -> (i32, i32, i32) {
    %c0_i32 = arith.constant 0 : i32
    %c0_i32_0 = arith.constant 0 : i32
    %c0_i32_1 = arith.constant 0 : i32
    return %arg0, %c0_i32, %c0_i32_0 : i32, i32, i32
  }
  func.func @transform_6(%arg0: i32, %arg1: memref<16xi32, #tpu.memory_space<smem>>) -> (i32, i32, i32) {
    %c0_i32 = arith.constant 0 : i32
    %c0_i32_0 = arith.constant 0 : i32
    %c0_i32_1 = arith.constant 0 : i32
    return %arg0, %c0_i32, %c0_i32_0 : i32, i32, i32
  }
  func.func @transform_7(%arg0: i32, %arg1: memref<16xi32, #tpu.memory_space<smem>>) -> (i32, i32, i32) {
    %c0_i32 = arith.constant 0 : i32
    %c0_i32_0 = arith.constant 0 : i32
    %c0_i32_1 = arith.constant 0 : i32
    return %arg0, %c0_i32, %c0_i32_0 : i32, i32, i32
  }
  func.func @transform_8(%arg0: i32, %arg1: memref<16xi32, #tpu.memory_space<smem>>) -> (i32, i32) {
    %c0_i32 = arith.constant 0 : i32
    %c0_i32_0 = arith.constant 0 : i32
    %c0_i32_1 = arith.constant 0 : i32
    return %c0_i32, %c0_i32_0 : i32, i32
  }
  func.func @transform_9(%arg0: i32, %arg1: memref<16xi32, #tpu.memory_space<smem>>) -> (i32, i32) {
    %c0_i32 = arith.constant 0 : i32
    %c0_i32_0 = arith.constant 0 : i32
    %c0_i32_1 = arith.constant 0 : i32
    return %c0_i32, %c0_i32_0 : i32, i32
  }
}

</mosaic_0001>

<bundles_post_ra>
// kernel: _lambda_.1
= control target key start
LH: loop header
LB: loop body
LE: loop exit
PB: predicated region body
PF: predicated region fallthrough
CT: control target
= control target key end

     0   :  { %s4206_s0 = inlined_call_operand.vmem [shape: s32[16], index: 0, kind: input, shape index: {}]   ;;  %s4207_s1 = inlined_call_operand.hbm [shape: f32[2,8], index: 1, kind: input, shape index: {}]   ;;  %s4208_s2 = inlined_call_operand.hbm [shape: f32[64,32], index: 2, kind: input, shape index: {}]   ;;  %s4209_s3 = inlined_call_operand.hbm [shape: f32[19,128], index: 3, kind: input, shape index: {}]   ;;  %s4210_s4 = inlined_call_operand.hbm [shape: bf16[2,32,96], index: 4, kind: input, shape index: {}]   ;;  %s4211_s5 = inlined_call_operand.hbm [shape: bf16[2,32,32], index: 5, kind: input, shape index: {}]   ;;  %s4212_s6 = inlined_call_operand.vmem [shape: bf16[2,32,128], index: 6, kind: input, shape index: {}]   ;;  %s4213_s7 = inlined_call_operand.hbm [shape: bf16[2,128,32], index: 7, kind: input, shape index: {}]   ;;  %s4214_s8 = inlined_call_operand.hbm [shape: f32[2,8,128], index: 8, kind: input, shape index: {}]   ;;  %s4215_s9 = inlined_call_operand.vmem [shape: bf16[32,128], index: 9, kind: input, shape index: {}]   ;;  %s4216_s10 = inlined_call_operand.hbm [shape: f32[2,128], index: 10, kind: output, shape index: {}]  }
   0x1   :  { %4239 = sst [smem:[#allocation29_spill]] %s4208_s2  ;;  %s15_s15 = sshll.u32 %s4206_s0, 4  ;;  %s16_s15 = int_to_ptr.vmem [resolvable:$true] %s15_s15 }
   0x2   :  { %4240 = sst [smem:[#allocation30_spill]] %s4210_s4  ;;  %s3123_s16 = scalar_lea.vmem %s16_s15, 16 }
   0x3   :  { %4241 = sst [smem:[#allocation31_spill]] %s4212_s6  ;;  %p3124_p0 = scmp.ne.s32.totalorder %s16_s15, %s3123_s16 }
   0x4   :  { %4242 = sst [smem:[#allocation32_spill]] %s4213_s7  ;;  %p3128_p1 = scmp.lt.s32.totalorder %s16_s15, %s16_s15 }
   0x5   :  { %4243 = sst [smem:[#allocation33_spill]] %s4215_s9  ;;  %p3129_p2 = scmp.lt.s32.totalorder %s3123_s16, %s3123_s16 }
   0x6   :  { %4244 = sst [smem:[#allocation34_spill]] %s4216_s10 }
   0x7   :  { %p3130_p3 = por %p3129_p2, %p3128_p1 }
   0x9   :  { %p3131_p4 = pnand %p3130_p3, %p3124_p0 }
   0xb   :  { %3134 = shalt.err (!%p3131_p4)  }
   0xc   :  { %s3419_s17 = smov [#allocation4]  }
   0xd   :  { %18 = dma.vmem_to_smem %s16_s15, 16, %s3419_s17, [#allocation3] }
   0xe   :  { %3381 = dma.done.wait [#allocation3], 16 }
   0xf   :  { %3382 = vsyncadd [#allocation3], 4294967280 }
  0x10   :  { %20 = sfence }
  0x11   :  { %21 = vsyncpa [#allocation6], 0 }
  0x12   :  { %22 = vsyncpa [#allocation9], 0 }
  0x13   :  { %23 = vsyncpa [#allocation12], 0 }
  0x14   :  { %25 = vsyncpa [#allocation12 + $0x1], 0 }
  0x15   :  { %26 = vsyncpa [#allocation15], 0 }
  0x16   :  { %28 = vsyncpa [#allocation15 + $0x1], 0 }
  0x17   :  { %29 = vsyncpa [#allocation7], 0  ;;  %s3502_s0 = smov 0   ;;  %s3504_s18 = smov 0  }
  0x18   :  { %s3506_s19 = smov 0   ;;  %s3508_s20 = smov 0  }
  0x19 LB: > { %4245 = sst [smem:[#allocation24_spill]] %s3409_s18  ;;  %s3521_s21 = sadd.s32 4294967295, %s3417_s20   ;;  %s3417_s20 = sphi %s3508_s20, %s4284_s20   ;;  %s3413_s19 = sphi %s3506_s19, %s4287_s19   ;;  %s3409_s18 = sphi %s3504_s18, %s4286_s18   ;;  %s3405_s0 = sphi %s3502_s0, %s4285_s0  }
  0x1a   : > { %4246 = sst [smem:[#allocation25_spill]] %s3413_s19  ;;  %s3524_s22 = sadd.s32 1, %s3417_s20  }
  0x1b   : > { %4247 = sst [smem:[#allocation26_spill]] %s3524_s22  ;;  %s102_s23 = ssub.s32 %s3417_s20, %s3524_s22 }
  0x1c   : > { %s105_s24 = sadd.s32 1, %s3413_s19  ;;  %p103_p5 = scmp.eq.s32.totalorder %s102_s23, 0 }
  0x1d   : > { %p112_p6 = scmp.ne.s32.totalorder %s3413_s19, %s3409_s18  ;;  %p113_p7 = scmp.eq.s32.totalorder %s3417_s20, 0 }
  0x1e   : > { %p118_p8 = scmp.ne.s32.totalorder %s3409_s18, %s3405_s0  ;;  %p4217_p10 = scmp.eq.s32.totalorder %s3521_s21, 0 }
  0x1f   : > { %s3534_s25 = scalar_select %p103_p5, %s3413_s19, %s105_s24  }
  0x20   : > { %p3536_p9 = por %p113_p7, %p112_p6  ;;  %p2725_p11 = scmp.ge.s32.totalorder %s3417_s20, 1 }
  0x21   : > { %4248 = sst [smem:[#allocation27_spill]] %s3534_s25  ;;  %p275_p12 = scmp.lt.s32.totalorder %s3417_s20, 3 }
  0x22   : > { %s4249_s26 = scalar_select %p3536_p9, 1, 0 }
  0x23   : > { %p3545_p13 = por %p4217_p10, %p118_p8  ;;  %p3550_p1 = pnand %p2725_p11, %p275_p12 }
  0x24   : > { %s3420_s29 = smov [#allocation8]   ;;  %s3565_s13 = sand.u32 1, %s3413_s19  }
  0x25   : > { %s4250_s27 = scalar_select %p3545_p13, 1, 0 }
  0x26   : > { %s4252_s28 = scalar_select %p3550_p1, 1, 0 }
  0x27   : > { %4251 = sst [smem:[#allocation28_spill]] %s4250_s27  ;;  %s298_s30 = sshll.u32 %s3420_s29, 4  ;;  %s299_s30 = int_to_ptr.vmem [resolvable:$true] %s298_s30 }
  0x28   : > { %p2984_p2 = pneg %p3550_p1  ;;  %s4254_s2 = sld [smem:[#allocation29_spill]] }
  0x2a   : > { %p3558_p3 = pnand %p2984_p2, %p4217_p10 }
  0x2c   : > { %s4253_s11 = scalar_select %p3558_p3, 1, 0 }
  0x2d   : > { %p3575_p6 = pneg %p3558_p3 }
  0x2e   : > { %s3135_s16 = scalar_lea.hbm %s4254_s2, 1024 }
  0x2f   : > { %p3136_p5 = scmp.ne.s32.totalorder %s4254_s2, %s3135_s16  ;;  %p3142_p11 = scmp.lt.u32.totalorder %s3135_s16, %s4254_s2 }
  0x30   : > { %s4255_s23 = scalar_select %p3575_p6, 1, 0 }
  0x31   : > { %p3138_p7 = pnand %p3575_p6, %p3136_p5 }
  0x33   : > { %p3139_p8 = pneg %p3138_p7 }
  0x35   : > { %p3144_p12 = pnand %p3142_p11, %p3139_p8 }
  0x37   : > { %3147 = shalt.err (!%p3144_p12)
}
  0x38   : > { %s3148_s14 = scalar_lea.vmem %s299_s30, 1024  ;;  %p3156_p4 = scmp.lt.s32.totalorder %s299_s30, %s299_s30 }
  0x39   : > { %p3149_p2 = scmp.ne.s32.totalorder %s299_s30, %s3148_s14  ;;  %p3157_p13 = scmp.lt.s32.totalorder %s3148_s14, %s3148_s14 }
  0x3b   : > { %p3151_p0 = pnand %p3149_p2, %p3575_p6  ;;  %p3158_p1 = por %p3157_p13, %p3156_p4 }
  0x3d   : > { %p3152_p10 = pneg %p3151_p0 }
  0x3f   : > { %p3159_p9 = pnand %p3158_p1, %p3152_p10 }
  0x41   : > { %3162 = shalt.err (!%p3159_p9)
}
  0x42   : > { %s4223_s15 = smov 128   ;;  %s4224_s16 = smov 8  }
  0x43   : > { %2990 = dma.hbm_to_vmem [thread:$0]  (!%p3558_p3), %s4254_s2, 1024, %s299_s30, [#allocation9], %s4223_s15, %s4223_s15, %s4224_s16  }
  0x44   : > { %s4225_s24 = sshll.u32 %s3565_s13, 4  ;;  %s2819_s29 = sshll.u32 %s3417_s20, 8 }
  0x45   : > { %s4256_s4 = sld [smem:[#allocation30_spill]]  ;;  %s332_s19 = scalar_lea.vmem [#allocation11], %s4225_s24 }
  0x46   : > { %s339_s22 = sshll.u32 %s332_s19, 4  ;;  %p4257_p9 = scmp.ne.s32.totalorder %s4249_s26, 0  ;;  %s3613_s22 = int_to_ptr.vmem [resolvable:$true] %s339_s22 }
  0x47   : > { %p4258_p10 = scmp.lt.s32.totalorder %s3417_s20, 2  ;;  %s4260_s30 = sand.u32 1, %s3417_s20  }
  0x48   : > { %s3617_s12 = scalar_lea.sflag [#allocation12], %s4260_s30 }
  0x49   : > { %p3609_p13 = pnand %p4258_p10, %p4257_p9 }
  0x4b   : > { %s3601_s25 = scalar_lea.hbm %s4256_s4, %s2819_s29  ;;  %p3623_p1 = pneg %p3609_p13 }
  0x4c   : > { %s4259_s17 = scalar_select %p3609_p13, 1, 0 }
  0x4d   : > { %s3163_s0 = scalar_lea.hbm %s3601_s25, 256  ;;  %s3168_s15 = scalar_lea.hbm %s4256_s4, 512 }
  0x4e   : > { %p3164_p0 = scmp.ne.s32.totalorder %s3601_s25, %s3163_s0  ;;  %p3169_p7 = scmp.lt.u32.totalorder %s3601_s25, %s4256_s4 }
  0x4f   : > { %s4261_s14 = scalar_select %p3623_p1, 1, 0 }
  0x50   : > { %p3166_p4 = pnand %p3623_p1, %p3164_p0  ;;  %p3170_p8 = scmp.lt.u32.totalorder %s3168_s15, %s3163_s0 }
  0x51   : > { %p3172_p12 = scmp.lt.u32.totalorder %s3163_s0, %s3601_s25 }
  0x52   : > { %p3167_p5 = pneg %p3166_p4  ;;  %p3171_p11 = por %p3170_p8, %p3169_p7 }
  0x54   : > { %p3173_p2 = por %p3172_p12, %p3171_p11 }
  0x56   : > { %p3174_p9 = pnand %p3173_p2, %p3167_p5 }
  0x58   : > { %3177 = shalt.err (!%p3174_p9)
}
  0x59   : > { %s3178_s30 = scalar_lea.vmem %s3613_s22, 256  ;;  %s3423_s19 = smov [#allocation11]  }
  0x5a   : > { %p3179_p10 = scmp.ne.s32.totalorder %s3613_s22, %s3178_s30  ;;  %s3183_s26 = sshll.u32 %s3423_s19, 4  ;;  %s3184_s26 = int_to_ptr.vmem [resolvable:$false] %s3183_s26 }
  0x5b   : > { %s3185_s16 = scalar_lea.vmem %s3184_s26, 512  ;;  %p3186_p3 = scmp.lt.s32.totalorder %s3613_s22, %s3184_s26 }
  0x5c   : > { %p3181_p0 = pnand %p3179_p10, %p3623_p1  ;;  %p3187_p6 = scmp.lt.s32.totalorder %s3185_s16, %s3178_s30 }
  0x5e   : > { %p3182_p4 = pneg %p3181_p0  ;;  %p3188_p7 = por %p3187_p6, %p3186_p3 }
  0x60   : > { %p3189_p8 = pnand %p3188_p7, %p3182_p4 }
  0x62   : > { %3192 = shalt.err (!%p3189_p8)
}
  0x63   : > { %s3424_s15 = smov 64   ;;  %s3425_s24 = smov 4  }
  0x64   : > { %2997 = dma.hbm_to_vmem [thread:$0]  (!%p3609_p13), %s3601_s25, 256, %s3613_s22, %s3617_s12, %s3424_s15, %s3424_s15, %s3425_s24  }
  0x65   : > { %s3655_s19 = scalar_lea.hbm %s4211_s5, %s2819_s29  ;;  %s4262_s26 = sshll.u32 %s3565_s13, 4 }
  0x66   : > { %s353_s16 = scalar_lea.vmem [#allocation13], %s4262_s26  ;;  %s2736_s4 = sshll.u32 %s3565_s13, 6 }
  0x67   : > { %s360_s2 = sshll.u32 %s353_s16, 4  ;;  %s2821_s10 = sshll.u32 %s3417_s20, 10  ;;  %s3659_s2 = int_to_ptr.vmem [resolvable:$true] %s360_s2 }
  0x68   : > { %s4263_s7 = sld [smem:[#allocation32_spill]]  ;;  %s382_s22 = scalar_lea.vmem [#allocation14], %s2736_s4 }
  0x69   : > { %s389_s25 = sshll.u32 %s382_s22, 4  ;;  %s4264_s29 = sand.u32 1, %s3417_s20   ;;  %s3668_s25 = int_to_ptr.vmem [resolvable:$true] %s389_s25 }
  0x6a   : > { %s3672_s0 = scalar_lea.sflag [#allocation15], %s4264_s29 }
  0x6e   : > { %s3666_s27 = scalar_lea.hbm %s4263_s7, %s2821_s10  ;;  %s3198_s9 = scalar_lea.hbm %s4263_s7, 2048 }
  0x6f   : > { %s3193_s30 = scalar_lea.hbm %s3666_s27, 1024  ;;  %p3199_p11 = scmp.lt.u32.totalorder %s3666_s27, %s4263_s7 }
  0x70   : > { %p3194_p3 = scmp.ne.s32.totalorder %s3666_s27, %s3193_s30  ;;  %p3200_p12 = scmp.lt.u32.totalorder %s3198_s9, %s3193_s30 }
  0x71   : > { %p3202_p9 = scmp.lt.u32.totalorder %s3193_s30, %s3666_s27 }
  0x72   : > { %p3196_p6 = pnand %p3194_p3, %p3623_p1  ;;  %p3201_p2 = por %p3200_p12, %p3199_p11 }
  0x74   : > { %p3197_p5 = pneg %p3196_p6  ;;  %p3203_p10 = por %p3202_p9, %p3201_p2 }
  0x76   : > { %p3204_p0 = pnand %p3203_p10, %p3197_p5 }
  0x78   : > { %3207 = shalt.err (!%p3204_p0)
}
  0x79   : > { %s3208_s4 = scalar_lea.vmem %s3668_s25, 1024  ;;  %s3426_s22 = smov [#allocation14]  }
  0x7a   : > { %p3209_p4 = scmp.ne.s32.totalorder %s3668_s25, %s3208_s4  ;;  %s3213_s29 = sshll.u32 %s3426_s22, 4  ;;  %s3214_s29 = int_to_ptr.vmem [resolvable:$false] %s3213_s29 }
  0x7b   : > { %s3215_s26 = scalar_lea.vmem %s3214_s29, 2048  ;;  %p3216_p3 = scmp.lt.s32.totalorder %s3668_s25, %s3214_s29 }
  0x7c   : > { %p3211_p7 = pnand %p3209_p4, %p3623_p1  ;;  %p3217_p6 = scmp.lt.s32.totalorder %s3215_s26, %s3208_s4 }
  0x7e   : > { %p3212_p8 = pneg %p3211_p7  ;;  %p3218_p11 = por %p3217_p6, %p3216_p3 }
  0x80   : > { %p3219_p12 = pnand %p3218_p11, %p3212_p8 }
  0x82   : > { %3222 = shalt.err (!%p3219_p12)
}
  0x83   : > { %3003 = dma.hbm_to_vmem [thread:$0]  (!%p3609_p13), %s3666_s27, 1024, %s3668_s25, %s3672_s0, %s3424_s15, %s3424_s15, %s3425_s24  }
  0x84   : > { %s3427_s30 = smov [#allocation5]   ;;  %s3428_s9 = smov [#allocation10]  }
  0x85   : > { %s288_s6 = sshll.u32 %s3427_s30, 4  ;;  %s311_s10 = sshll.u32 %s3428_s9, 4  ;;  %s289_s6 = int_to_ptr.vmem [resolvable:$true] %s288_s6  ;;  %s312_s10 = int_to_ptr.vmem [resolvable:$true] %s311_s10 }
  0x86   : > { %s3223_s22 = scalar_lea.hbm %s4207_s1, 32  ;;  %p4265_p2 = scmp.ne.s32.totalorder %s4255_s23, 0 }
  0x87   : > { %p3224_p5 = scmp.ne.s32.totalorder %s4207_s1, %s3223_s22  ;;  %p3230_p0 = scmp.lt.u32.totalorder %s3223_s22, %s4207_s1 }
  0x89   : > { %p3226_p9 = pnand %p3224_p5, %p4265_p2 }
  0x8b   : > { %p3227_p10 = pneg %p3226_p9 }
  0x8d   : > { %p3232_p4 = pnand %p3230_p0, %p3227_p10 }
  0x8f   : > { %3235 = shalt.err (!%p3232_p4)
}
  0x90   : > { %s3236_s27 = scalar_lea.vmem %s289_s6, 32  ;;  %p3244_p6 = scmp.lt.s32.totalorder %s289_s6, %s289_s6 }
  0x91   : > { %p3237_p7 = scmp.ne.s32.totalorder %s289_s6, %s3236_s27  ;;  %p3245_p11 = scmp.lt.s32.totalorder %s3236_s27, %s3236_s27 }
  0x93   : > { %p3239_p8 = pnand %p3237_p7, %p4265_p2  ;;  %p3246_p12 = por %p3245_p11, %p3244_p6 }
  0x95   : > { %p3240_p3 = pneg %p3239_p8 }
  0x97   : > { %p3247_p13 = pnand %p3246_p12, %p3240_p3 }
  0x99   : > { %3250 = shalt.err (!%p3247_p13)
}
  0x9a   : > { %p4266_p5 = scmp.ne.s32.totalorder %s4253_s11, 0  ;;  %s2739_s7 = sshll.u32 %s3565_s13, 3 }
  0x9b   : > { %s3251_s16 = scalar_lea.hbm %s4209_s3, 384 }
  0x9c   : > { %2987 = dma.hbm_to_vmem [thread:$0]  (!%p4266_p5), %s4207_s1, 32, %s289_s6, [#allocation6]  }
  0x9d   : > { %p3252_p9 = scmp.ne.s32.totalorder %s4209_s3, %s3251_s16  ;;  %p3258_p0 = scmp.lt.u32.totalorder %s3251_s16, %s4209_s3 }
  0x9f   : > { %p3254_p13 = pnand %p3252_p9, %p4265_p2 }
  0xa1   : > { %p3255_p10 = pneg %p3254_p13 }
  0xa3   : > { %p3260_p4 = pnand %p3258_p0, %p3255_p10 }
  0xa5   : > { %3263 = shalt.err (!%p3260_p4)
}
  0xa6   : > { %s3264_s6 = scalar_lea.vmem %s312_s10, 384  ;;  %p3272_p6 = scmp.lt.s32.totalorder %s312_s10, %s312_s10 }
  0xa7   : > { %p3265_p7 = scmp.ne.s32.totalorder %s312_s10, %s3264_s6  ;;  %p3273_p11 = scmp.lt.s32.totalorder %s3264_s6, %s3264_s6 }
  0xa9   : > { %p3267_p8 = pnand %p3265_p7, %p4265_p2  ;;  %p3274_p12 = por %p3273_p11, %p3272_p6 }
  0xab   : > { %p3268_p3 = pneg %p3267_p8 }
  0xad   : > { %p3275_p1 = pnand %p3274_p12, %p3268_p3 }
  0xaf   : > { %3278 = shalt.err (!%p3275_p1)
}
  0xb0   : > { %s4267_s27 = smov 8   ;;  %s4268_s25 = smov 128  }
  0xb1   : > { %2993 = dma.hbm_to_vmem [thread:$0]  (!%p4266_p5), %s4209_s3, 384, %s312_s10, [#allocation9], %s4268_s25, %s4268_s25, %s4267_s27  }
  0xb2   : > { %s3279_s23 = scalar_lea.hbm %s3655_s19, 256  ;;  %p4269_p9 = scmp.ne.s32.totalorder %s4261_s14, 0 }
  0xb3   : > { %p3280_p2 = scmp.ne.s32.totalorder %s3655_s19, %s3279_s23  ;;  %s3284_s11 = scalar_lea.hbm %s4211_s5, 512 }
  0xb4   : > { %p3285_p1 = scmp.lt.u32.totalorder %s3655_s19, %s4211_s5  ;;  %p3286_p0 = scmp.lt.u32.totalorder %s3284_s11, %s3279_s23 }
  0xb5   : > { %p3282_p13 = pnand %p3280_p2, %p4269_p9  ;;  %p3288_p7 = scmp.lt.u32.totalorder %s3279_s23, %s3655_s19 }
  0xb6   : > { %p3287_p4 = por %p3286_p0, %p3285_p1 }
  0xb7   : > { %p3283_p10 = pneg %p3282_p13 }
  0xb8   : > { %p3289_p8 = por %p3288_p7, %p3287_p4 }
  0xba   : > { %p3290_p3 = pnand %p3289_p8, %p3283_p10 }
  0xbc   : > { %3293 = shalt.err (!%p3290_p3)
}
  0xbd   : > { %s3294_s10 = scalar_lea.vmem %s3659_s2, 256  ;;  %s3429_s29 = smov [#allocation13]  }
  0xbe   : > { %p3295_p5 = scmp.ne.s32.totalorder %s3659_s2, %s3294_s10  ;;  %s3299_s26 = sshll.u32 %s3429_s29, 4  ;;  %s3300_s26 = int_to_ptr.vmem [resolvable:$false] %s3299_s26 }
  0xbf   : > { %s3301_s6 = scalar_lea.vmem %s3300_s26, 512  ;;  %p3302_p12 = scmp.lt.s32.totalorder %s3659_s2, %s3300_s26 }
  0xc0   : > { %p3297_p6 = pnand %p3295_p5, %p4269_p9  ;;  %p3303_p2 = scmp.lt.s32.totalorder %s3301_s6, %s3294_s10 }
  0xc2   : > { %p3298_p11 = pneg %p3297_p6  ;;  %p3304_p13 = por %p3303_p2, %p3302_p12 }
  0xc4   : > { %p3305_p1 = pnand %p3304_p13, %p3298_p11 }
  0xc6   : > { %3308 = shalt.err (!%p3305_p1)
}
  0xc7   : > { %p4270_p10 = scmp.ne.s32.totalorder %s4259_s17, 0  ;;  %s2740_s27 = sshll.u32 %s3417_s20, 7 }
  0xc8   : > { %s3768_s18 = scalar_lea.hbm %s4214_s8, %s2740_s27  ;;  %s403_s23 = scalar_lea.vmem [#allocation16], %s2739_s7 }
  0xc9   : > { %3000 = dma.hbm_to_vmem [thread:$0]  (!%p4270_p10), %s3655_s19, 256, %s3659_s2, %s3617_s12, %s3424_s15, %s3424_s15, %s3425_s24  }
  0xca   : > { %s410_s9 = sshll.u32 %s403_s23, 4  ;;  %s3309_s16 = scalar_lea.hbm %s3768_s18, 128  ;;  %s411_s9 = int_to_ptr.vmem [resolvable:$true] %s410_s9 }
  0xcb   : > { %p3310_p0 = scmp.ne.s32.totalorder %s3768_s18, %s3309_s16  ;;  %s3314_s12 = scalar_lea.hbm %s4214_s8, 256 }
  0xcc   : > { %p3315_p8 = scmp.lt.u32.totalorder %s3768_s18, %s4214_s8  ;;  %p3316_p3 = scmp.lt.u32.totalorder %s3314_s12, %s3309_s16 }
  0xcd   : > { %p3312_p4 = pnand %p3310_p0, %p4269_p9  ;;  %p3318_p6 = scmp.lt.u32.totalorder %s3309_s16, %s3768_s18 }
  0xce   : > { %p3317_p5 = por %p3316_p3, %p3315_p8 }
  0xcf   : > { %p3313_p7 = pneg %p3312_p4 }
  0xd0   : > { %p3319_p11 = por %p3318_p6, %p3317_p5 }
  0xd2   : > { %p3320_p12 = pnand %p3319_p11, %p3313_p7 }
  0xd4   : > { %3323 = shalt.err (!%p3320_p12)
}
  0xd5   : > { %s3324_s13 = scalar_lea.vmem %s411_s9, 128  ;;  %s3430_s19 = smov [#allocation16]  }
  0xd6   : > { %p3325_p2 = scmp.ne.s32.totalorder %s411_s9, %s3324_s13  ;;  %s3329_s7 = sshll.u32 %s3430_s19, 4  ;;  %s3330_s7 = int_to_ptr.vmem [resolvable:$false] %s3329_s7 }
  0xd7   : > { %s3331_s11 = scalar_lea.vmem %s3330_s7, 256  ;;  %p3332_p0 = scmp.lt.s32.totalorder %s411_s9, %s3330_s7 }
  0xd8   : > { %p3327_p13 = pnand %p3325_p2, %p4269_p9  ;;  %p3333_p4 = scmp.lt.s32.totalorder %s3331_s11, %s3324_s13 }
  0xda   : > { %p3328_p1 = pneg %p3327_p13  ;;  %p3334_p10 = por %p3333_p4, %p3332_p0 }
  0xdc   : > { %p3335_p3 = pnand %p3334_p10, %p3328_p1 }
  0xde   : > { %3338 = shalt.err (!%p3335_p3)
}
  0xdf   : > { %p4271_p8 = scmp.ne.s32.totalorder %s4259_s17, 0  ;;  %p4272_p7 = scmp.ne.s32.totalorder %s4252_s28, 0 }
  0xe0   : > { %p4273_p9 = scmp.eq.s32.totalorder (!%p4272_p7), %s3521_s21, 0 }
  0xe1   : > { %3006 = dma.hbm_to_vmem [thread:$0]  (!%p4271_p8), %s3768_s18, 128, %s411_s9, %s3672_s0  }
  0xe2   : > { %419 = sbr.rel (%p4272_p7) target bundleno = 3601 (0xe11), region = 56 }
  0xe9   : > { %3384 = dma.done.wait (%p4273_p9), [#allocation6], 32   ;;  %p4274_p5 = pmov %p4273_p9 }
  0xeb   : > { %3386 = vsyncadd (%p4274_p5), [#allocation6], 4294967264  ;;  %p4275_p6 = pmov %p4274_p5 }
  0xec   : > { %p4276_p10 = pmov %p4274_p5 }
  0xed   : > { %3388 = dma.done.wait (%p4275_p6), [#allocation9], 1408  }
  0xee   : > { %3390 = vsyncadd (%p4276_p10), [#allocation9], 4294965888  ;;  %s4277_s17 = sld [smem:[#allocation24_spill]]  ;;  %s4278_s14 = sld [smem:[#allocation28_spill]] }
  0xef   : > { %s433_s4 = sand.u32 1, %s3521_s21  }
  0xf0   : > { %s434_s28 = scalar_lea.sflag [#allocation12], %s433_s4 }
  0xf4   : > { %s435_s0 = sand.u32 1, %s4277_s17   ;;  %p4279_p11 = scmp.ne.s32.totalorder %s4278_s14, 0 }
  0xf5   : > { %s2745_s22 = sshll.u32 %s435_s0, 4 }
  0xf6   : > { %s3802_s10 = scalar_lea.vmem [#allocation11], %s2745_s22 }
  0xf7   : > { %3392 = dma.done.wait (%p4279_p11), %s434_s28, 512  }
  0xf8   : > { %3394 = vsyncadd (%p4279_p11), %s434_s28, 4294966784  ;;  %s2747_s29 = sshll.u32 %s435_s0, 6  ;;  %s3808_s26 = scalar_lea.vmem [#allocation13], %s2745_s22 }
  0xf9   : > { %s452_s6 = scalar_lea.sflag [#allocation15], %s433_s4  ;;  %s3810_s27 = scalar_lea.vmem [#allocation14], %s2747_s29 }
  0xfa   : > { %3396 = dma.done.wait (%p4279_p11), %s452_s6, 1152  }
  0xfb   : > { %3398 = vsyncadd (%p4279_p11), %s452_s6, 4294966144  ;;  %s2748_s25 = sshll.u32 %s435_s0, 3  ;;  %p514_p12 = scmp.lt.s32.totalorder %s3521_s21, 1 }
  0xfc   : > { %s4280_s16 = sld [smem:[#allocation31_spill]]  ;;  %s3823_s20 = scalar_lea.vmem [#allocation16], %s2748_s25 }
  0xfd   : > { %s515_s30 = scalar_select %p514_p12, %s3521_s21, 1 }
  0xfe   : > { %p4281_p2 = scmp.ne.s32.totalorder %s3521_s21, 0 }
  0xff   : > { %s2822_s18 = sshll.u32 %s515_s30, 4  ;;  %s524_s12 = sld [smem:[#allocation4]] (!%p4281_p2)  ;;  %vm527_vm0 = vcmask (!%p4281_p2), 253952   ;;  %v591_v12 = vld [vmem:[#allocation10] sm:$0xff] (!%p4281_p2)  ;;  %vm597_vm1 = vcmask (!%p4281_p2), 261120   ;;  %v592_v20 = vld [vmem:[#allocation10 + $0x8] sm:$0xff] (!%p4281_p2) }
 0x100   : > { %523 = sbr.rel (%p4281_p2) target bundleno = 604 (0x25c), region = 88  ;;  %s2752_s15 = sld [smem:[#allocation4 + $0x1]] (!%p4281_p2)  ;;  %v2767_v41 = vld [vmem:[#allocation10 + $0x10] ss:$0 sm:$0xff] (!%p4281_p2)  ;;  %v2768_v43 = vld [vmem:[#allocation10 + $0x11] ss:$0 sm:$0xff] (!%p4281_p2) }
 0x101   : > { %s2753_s24 = sld [smem:[#allocation4 + $0x2]] (!%p4281_p2)  ;;  %s2754_s13 = sld [smem:[#allocation4 + $0x3]] (!%p4281_p2) }
 0x102   : > { %s3821_s2 = scalar_lea.vmem %s4280_s16, %s2822_s18  ;;  %s2755_s19 = sld [smem:[#allocation4 + $0x4]] (!%p4281_p2) }
 0x103   : > { %s2756_s7 = sld [smem:[#allocation4 + $0x5]] (!%p4281_p2)  ;;  %s2757_s11 = sld [smem:[#allocation4 + $0x6]] (!%p4281_p2) }
 0x104   : > { %s2758_s17 = sld [smem:[#allocation4 + $0x7]] (!%p4281_p2)  ;;  %s3827_s14 = sld [smem:[#allocation4 + $0x8]] (!%p4281_p2) }
 0x105   : > { %s3829_s4 = sld [smem:[#allocation4 + $0x9]] (!%p4281_p2)  ;;  %s3831_s0 = sld [smem:[#allocation4 + $0xa]] (!%p4281_p2) }
 0x106   : > { %s3833_s22 = sld [smem:[#allocation4 + $0xb]] (!%p4281_p2)  ;;  %s525_s28 = scalar_lea.vmem (!%p4281_p2), [#allocation8], %s524_s12 }
 0x107   : > { %v526_v0 = vld [vmem:[%s525_s28] sm:$0x1]  ;;  %s530_s29 = scalar_lea.vmem [#allocation8], %s2752_s15  ;;  %s534_s6 = scalar_lea.vmem [#allocation8], %s2753_s24 }
 0x108   : > { %v531_v1 = vld [vmem:[%s530_s29] sm:$0x1]  ;;  %528 = vst.msk [vmem:[#allocation2] sm:$0x1] %vm527_vm0, %v526_v0  ;;  %s538_s25 = scalar_lea.vmem [#allocation8], %s2754_s13  ;;  %s542_s30 = scalar_lea.vmem [#allocation8], %s2755_s19 }
 0x109   : > { %532 = vst.msk [vmem:[#allocation2 + $0x1] sm:$0x1] %vm527_vm0, %v531_v1  ;;  %v535_v2 = vld [vmem:[%s534_s6] sm:$0x1]  ;;  %s546_s18 = scalar_lea.vmem [#allocation8], %s2756_s7  ;;  %s550_s23 = scalar_lea.vmem [#allocation8], %s2757_s11 }
 0x10a   : > { %v539_v3 = vld [vmem:[%s538_s25] sm:$0x1]  ;;  %536 = vst.msk [vmem:[#allocation2 + $0x2] sm:$0x1] %vm527_vm0, %v535_v2  ;;  %s554_s9 = scalar_lea.vmem [#allocation8], %s2758_s17  ;;  %s558_s16 = scalar_lea.vmem [#allocation8], %s3827_s14 }
 0x10b   : > { %540 = vst.msk [vmem:[#allocation2 + $0x3] sm:$0x1] %vm527_vm0, %v539_v3  ;;  %v543_v4 = vld [vmem:[%s542_s30] sm:$0x1]  ;;  %s562_s12 = scalar_lea.vmem [#allocation8], %s3829_s4  ;;  %s566_s15 = scalar_lea.vmem [#allocation8], %s3831_s0 }
 0x10c   : > { %v547_v5 = vld [vmem:[%s546_s18] sm:$0x1]  ;;  %544 = vst.msk [vmem:[#allocation2 + $0x4] sm:$0x1] %vm527_vm0, %v543_v4  ;;  %s570_s24 = scalar_lea.vmem [#allocation8], %s3833_s22  ;;  %s2763_s13 = sld [smem:[#allocation4 + $0xc]] }
 0x10d   : > { %548 = vst.msk [vmem:[#allocation2 + $0x5] sm:$0x1] %vm527_vm0, %v547_v5  ;;  %v551_v6 = vld [vmem:[%s550_s23] sm:$0x1]  ;;  %s2764_s19 = sld [smem:[#allocation4 + $0xd]]  ;;  %s2765_s7 = sld [smem:[#allocation4 + $0xe]] }
 0x10e   : > { %v555_v7 = vld [vmem:[%s554_s9] sm:$0x1]  ;;  %552 = vst.msk [vmem:[#allocation2 + $0x6] sm:$0x1] %vm527_vm0, %v551_v6  ;;  %s2766_s11 = sld [smem:[#allocation4 + $0xf]] }
 0x10f   : > { %556 = vst.msk [vmem:[#allocation2 + $0x7] sm:$0x1] %vm527_vm0, %v555_v7  ;;  %v559_v8 = vld [vmem:[%s558_s16] sm:$0x1] }
 0x110   : > { %v563_v9 = vld [vmem:[%s562_s12] sm:$0x1]  ;;  %560 = vst.msk [vmem:[#allocation2 + $0x8] sm:$0x1] %vm527_vm0, %v559_v8 }
 0x111   : > { %564 = vst.msk [vmem:[#allocation2 + $0x9] sm:$0x1] %vm527_vm0, %v563_v9  ;;  %v567_v10 = vld [vmem:[%s566_s15] sm:$0x1] }
 0x112   : > { %v571_v11 = vld [vmem:[%s570_s24] sm:$0x1]  ;;  %568 = vst.msk [vmem:[#allocation2 + $0xa] sm:$0x1] %vm527_vm0, %v567_v10  ;;  %s574_s17 = scalar_lea.vmem [#allocation8], %s2763_s13 }
 0x113   : > { %572 = vst.msk [vmem:[#allocation2 + $0xb] sm:$0x1] %vm527_vm0, %v571_v11  ;;  %v575_v15 = vld [vmem:[%s574_s17] sm:$0x1]  ;;  %s578_s14 = scalar_lea.vmem [#allocation8], %s2764_s19  ;;  %s582_s4 = scalar_lea.vmem [#allocation8], %s2765_s7 }
 0x114   : > { %576 = vst.msk [vmem:[#allocation2 + $0xc] sm:$0x1] %vm527_vm0, %v575_v15  ;;  %v579_v16 = vld [vmem:[%s578_s14] sm:$0x1]  ;;  %s586_s0 = scalar_lea.vmem [#allocation8], %s2766_s11 }
 0x115   : > { %v583_v17 = vld [vmem:[%s582_s4] sm:$0x1]  ;;  %580 = vst.msk [vmem:[#allocation2 + $0xd] sm:$0x1] %vm527_vm0, %v579_v16 }
 0x116   : > { %v589_v13 = vld [vmem:[#allocation2] sm:$0xff]  ;;  %584 = vst.msk [vmem:[#allocation2 + $0xe] sm:$0x1] %vm527_vm0, %v583_v17 }
 0x117   : > { %v593_v14 = vadd.f32 %v591_v12, %v589_v13  ;;  %v587_v19 = vld [vmem:[%s586_s0] sm:$0x1] }
 0x118   : > { %588 = vst.msk [vmem:[#allocation2 + $0xf] sm:$0x1] %vm527_vm0, %v587_v19 }
 0x119   : > { %v598_v18 = vsel %vm597_vm1, %v593_v14, 0.0 }
 0x11a   : > { %599 = vadd.xlane.f32.xlu0 %v598_v18 }
 0x11f   : > { %v590_v21 = vld [vmem:[#allocation2 + $0x8] sm:$0xff] }
 0x120   : > { %v594_v22 = vadd.f32 %v592_v20, %v590_v21 }
 0x122   : > { %v601_v23 = vsel %vm597_vm1, %v594_v22, 0.0 }
 0x123   : > { %602 = vadd.xlane.f32.xlu0 %v601_v23 }
 0x1a7   : > { %v600_v24 = vpop.xlane.xlu0 %599 }
 0x1a8   : > { %v605_v25 = vmul.f32 0.03125, %v600_v24 }
 0x1aa   : > { %v607_v26 = vsub.f32 %v593_v14, %v605_v25 }
 0x1ac   : > { %v609_v27 = vmul.f32 %v607_v26, %v607_v26 }
 0x1ae   : > { %v611_v28 = vsel %vm597_vm1, %v609_v27, 0.0 }
 0x1af   : > { %612 = vadd.xlane.f32.xlu1 %v611_v28 }
 0x1b0   : > { %v603_v29 = vpop.xlane.xlu0 %602 }
 0x1b1   : > { %v606_v30 = vmul.f32 0.03125, %v603_v29 }
 0x1b3   : > { %v608_v31 = vsub.f32 %v594_v22, %v606_v30 }
 0x1b5   : > { %v610_v32 = vmul.f32 %v608_v31, %v608_v31 }
 0x1b7   : > { %v614_v33 = vsel %vm597_vm1, %v610_v32, 0.0 }
 0x1b8   : > { %615 = vadd.xlane.f32.xlu1 %v614_v33 }
 0x23c   : > { %v613_v34 = vpop.xlane.xlu1 %612 }
 0x23d   : > { %v617_v35 = vmul.f32 0.03125, %v613_v34 }
 0x23f   : > { %v619_v36 = vadd.f32 1e-12, %v617_v35 }
 0x241   : > { %3069 = vrsqrt.f32 %v619_v36 }
 0x245   : > { %v616_v37 = vpop.xlane.xlu1 %615 }
 0x246   : > { %v618_v38 = vmul.f32 0.03125, %v616_v37 }
 0x248   : > { %v620_v39 = vadd.f32 1e-12, %v618_v38 }
 0x24a   : > { %3071 = vrsqrt.f32 %v620_v39 }
 0x24b   : > { %v3070_v40 = vpop.eup %3069 }
 0x24c   : > { %v623_v42 = vmul.f32 %v3070_v40, %v607_v26 }
 0x24e   : > { %v629_v44 = vmul.f32 %v2767_v41, %v623_v42 }
 0x250   : > { %v635_v45 = vadd.f32 %v2768_v43, %v629_v44 }
 0x252   : > { %637 = vst.msk [vmem:[#allocation2] sm:$0xff] %vm597_vm1, %v635_v45 }
 0x254   : > { %v3072_v46 = vpop.eup %3071 }
 0x255   : > { %v624_v47 = vmul.f32 %v3072_v46, %v608_v31 }
 0x257   : > { %v630_v48 = vmul.f32 %v2767_v41, %v624_v47 }
 0x259   : > { %v636_v49 = vadd.f32 %v2768_v43, %v630_v48 }
 0x25b   : > { %638 = vst.msk [vmem:[#allocation2 + $0x8] sm:$0xff] %vm597_vm1, %v636_v49 }
 0x25c PF: > { %v3078_v50 = vld [vmem:[%s3802_s10] sm:$0xff]   ;;  %v3431_v51 = vmov 0.0   ;;  %v3079_v52 = vld [vmem:[%s3802_s10 + $0x8] sm:$0xff]   ;;  %vm3432_vm2 = vmmov 0   ;;  %vm663_vm3 = vcmask 261120   ;;  %v647_v56 = vlaneseq  ;;  %s3433_s10 = smov 112  }
 0x25d   : > { %2860 = vmatprep.subr.bf16.mxu0 %v3431_v51  ;;  %2880 = vmatprep.subr.bf16.mxu1 %v3431_v51  ;;  %v3867_v53 = vld [vmem:[#allocation2] sm:$0xff]  ;;  %v3886_v59 = vld [vmem:[%s3823_s20] sm:$0xff]  ;;  %s3434_s22 = smov 96   ;;  %v3435_v8 = vmov 1983009808   ;;  %v3437_v16 = vmov 0  }
 0x25e   : > { %2861 = vmatpush3.bf16.msra.mxu0 %v3078_v50  ;;  %2864 = vmatprep.mubr.msk.bf16.mxu0 %vm3432_vm2, %v3431_v51  ;;  %v3880_v57 = vshrl.u32 %v647_v56, 7  ;;  %v731_v9 = vunpack.c.l.s4 %v3435_v8  ;;  %v3436_v11 = vmov 1934713408   ;;  %v3902_v17 = vpack.i.b16 %v3437_v16, %v3437_v16  ;;  %s3439_s28 = smov 64   ;;  %s3440_s29 = smov 16  }
 0x25f   : > { %2862 = vmatprep.subr.bf16.mxu0 %v3431_v51  ;;  %2882 = vmatprep.mubr.msk.bf16.mxu1 %vm3432_vm2, %v3431_v51  ;;  %v746_v12 = vunpack.c.l.s4 %v3436_v11  ;;  %vm1472_vm4 = vcmask 130048   ;;  %vm1657_vm5 = vcmask 64512   ;;  %vm1709_vm6 = vcmask 1043456   ;;  %p2810_p13 = scmp.ne.s32.totalorder %s3521_s21, 1 }
 0x260   : > { %v3883_v58 = vsub.s32 0, %v3880_v57  ;;  %v732_v10 = vunpack.c.0.s8 %v731_v9  ;;  %vm3442_vm7 = vmmov (!%p2810_p13), 0  }
 0x261   : > { %v747_v15 = vunpack.c.0.s8 %v746_v12 }
 0x262   : > { %v3869_v54 = vld [vmem:[#allocation2 + $0x8] sm:$0xff]  ;;  %2863 = vmatpush3.bf16.msra.mxu0 %v3079_v52  ;;  %v650_v60 = vrot.slane %v3886_v59, %v3883_v58  ;;  %v3898_v14 = vsub.s32 %v732_v10, %v3880_v57 }
 0x263   : > { %v642_v55 = vpack.c.bf16 %v3869_v54, %v3867_v53  ;;  %2868 = vmatprep.subr.bf16.mxu0 %v3431_v51  ;;  %v3905_v22 = vsub.s32 %v747_v15, %v3880_v57 }
 0x265   : > { %2865 = vmatmul.mubr.msk.bf16.vlgmr.msra.gmra.mrb[0].mxu0 %vm663_vm3, %v642_v55 }
 0x266   : > { %2870 = vmatprep.mubr.msk.bf16.mxu0 %vm3432_vm2, %v3431_v51 }
 0x338   : > { %v701_v61 = vpop.f32.mrb[0].mxu0 }
 0x339   : > { %v702_v62 = vadd.f32 %v701_v61, %v650_v60  ;;  %v2866_v63 = vpop.f32.mrb[1].mxu0 }
 0x33a   : > { %v704_v0 = vpop.f32.mrb[2].mxu0 }
 0x33b   : > { %v705_v1 = vadd.f32 %v704_v0, %v650_v60  ;;  %v2867_v2 = vpop.f32.mrb[3].mxu0  ;;  %v708_v3 = vmul.f32 0.25, %v702_v62 }
 0x33d   : > { %v709_v4 = vmul.f32 0.25, %v705_v1  ;;  %v3890_v5 = vpack.c.bf16 %v705_v1, %v702_v62 }
 0x33f   : > { %936 = vrot.lane.b32.xlu0 %v3890_v5, %s3433_s10  ;;  %v710_v6 = vpack.c.bf16 %v709_v4, %v708_v3 }
 0x341   : > { %v719_v36 = vshrl.u32 %v710_v6, 16 }
 0x343   : > { %938 = vrot.lane.b32.xlu0 %v3890_v5, %s3434_s22 }
 0x3b1   : > { %v3894_v7 = vpop.permute.xlu0 %936 }
 0x3b2   : > { %940 = vrot.lane.b32.xlu1 %v3894_v7, %s3434_s22 }
 0x3b5   : > { %v939_v13 = vpop.permute.xlu0 %938 }
 0x3b6   : > { %713 = vrot.lane.b32.xlu1 %v710_v6, %s3433_s10  ;;  %v946_v19 = vshrl.u32 %v939_v13, 16 }
 0x424   : > { %v941_v18 = vpop.permute.xlu1 %940 }
 0x425   : > { %v944_v20 = vpack.i.b16 %v941_v18, %v939_v13  ;;  %v947_v21 = vshrl.u32 %v941_v18, 16 }
 0x427   : > { %v948_v23 = vpack.i.b16 %v947_v21, %v946_v19  ;;  %v950_v24 = vcombine.high %v944_v20, %v3902_v17  ;;  %v957_v25 = vrot.slane %v944_v20, %v3898_v14 }
 0x428   : > { %v714_v26 = vpop.permute.xlu1 %713 }
 0x429   : > { %v964_v27 = vrot.slane %v950_v24, %v3898_v14  ;;  %v965_v28 = vcombine.high %v957_v25, %v3437_v16  ;;  %v999_v29 = vcombine.high %v948_v23, %v3902_v17  ;;  %v1006_v30 = vrot.slane %v948_v23, %v3898_v14 }
 0x42a   : > { %v717_v31 = vpack.i.b16 %v714_v26, %v710_v6  ;;  %v720_v32 = vshrl.u32 %v714_v26, 16  ;;  %v972_v33 = vrot.slane %v957_v25, %v3905_v22 }
 0x42b   : > { %v979_v34 = vrot.slane %v965_v28, %v3905_v22  ;;  %v980_v35 = vcombine.high %v964_v27, %v3437_v16  ;;  %v1014_v37 = vcombine.high %v1006_v30, %v3437_v16  ;;  %v1013_v39 = vrot.slane %v999_v29, %v3898_v14 }
 0x42c   : > { %v729_v38 = vcombine.high %v717_v31, %v3902_v17  ;;  %v1021_v40 = vrot.slane %v1006_v30, %v3905_v22  ;;  %v721_v42 = vpack.i.b16 %v720_v32, %v719_v36  ;;  %v736_v45 = vrot.slane %v717_v31, %v3898_v14 }
 0x42d   : > { %v1048_v41 = vcombine.low %v972_v33, %v979_v34  ;;  %v1028_v43 = vrot.slane %v1014_v37, %v3905_v22  ;;  %v2776_v44 = vcombine.high %v972_v33, %v979_v34  ;;  %v994_v47 = vrot.slane %v980_v35, %v3905_v22 }
 0x42e   : > { %v743_v46 = vrot.slane %v729_v38, %v3898_v14  ;;  %v987_v48 = vrot.slane %v964_v27, %v3905_v22  ;;  %v744_v52 = vcombine.high %v736_v45, %v3437_v16  ;;  %v1029_v55 = vcombine.high %v1013_v39, %v3437_v16 }
 0x42f   : > { %v1072_v49 = vcombine.low %v1021_v40, %v1028_v43  ;;  %v2777_v50 = vcombine.high %v1021_v40, %v1028_v43  ;;  %v1055_v56 = vrot.slane %v1048_v41, %v3898_v14  ;;  %v1063_v60 = vrot.slane %v2776_v44, %v3898_v14 }
 0x430   : > { %v778_v61 = vcombine.high %v721_v42, %v3902_v17  ;;  %v751_v62 = vrot.slane %v736_v45, %v3905_v22  ;;  %v758_v63 = vrot.slane %v744_v52, %v3905_v22  ;;  %v759_v0 = vcombine.high %v743_v46, %v3437_v16 }
 0x431   : > { %v785_v1 = vrot.slane %v721_v42, %v3898_v14  ;;  %v1096_v2 = vcombine.low %v987_v48, %v994_v47  ;;  %v1079_v4 = vrot.slane %v1072_v49, %v3898_v14  ;;  %v1087_v6 = vrot.slane %v2777_v50, %v3898_v14 }
 0x432   : > { %v792_v3 = vrot.slane %v778_v61, %v3898_v14  ;;  %v827_v9 = vcombine.low %v751_v62, %v758_v63  ;;  %v2772_v10 = vcombine.high %v751_v62, %v758_v63  ;;  %v1043_v11 = vrot.slane %v1029_v55, %v3905_v22 }
 0x433   : > { %v793_v8 = vcombine.high %v785_v1, %v3437_v16  ;;  %v2778_v12 = vcombine.high %v987_v48, %v994_v47  ;;  %v1064_v15 = vcombine.low %v1055_v56, %v1063_v60  ;;  %v1036_v18 = vrot.slane %v1013_v39, %v3905_v22 }
 0x434   : > { %v808_v13 = vcombine.high %v792_v3, %v3437_v16  ;;  %v773_v19 = vrot.slane %v759_v0, %v3905_v22  ;;  %v800_v20 = vrot.slane %v785_v1, %v3905_v22  ;;  %v815_v23 = vrot.slane %v792_v3, %v3905_v22 }
 0x435   : > { %v807_v21 = vrot.slane %v793_v8, %v3905_v22  ;;  %v1088_v25 = vcombine.low %v1079_v4, %v1087_v6  ;;  %v1103_v26 = vrot.slane %v1096_v2, %v3898_v14  ;;  %v834_v27 = vrot.slane %v827_v9, %v3898_v14 }
 0x436   : > { %v822_v24 = vrot.slane %v808_v13, %v3905_v22  ;;  %v842_v28 = vrot.slane %v2772_v10, %v3898_v14  ;;  %v1071_v31 = vrot.slane %v1064_v15, %v3905_v22  ;;  %v1111_v33 = vrot.slane %v2778_v12, %v3898_v14 }
 0x437   : > { %v851_v29 = vcombine.low %v800_v20, %v807_v21  ;;  %v2773_v30 = vcombine.high %v800_v20, %v807_v21  ;;  %v1095_v32 = vrot.slane %v1088_v25, %v3905_v22  ;;  %v1120_v34 = vcombine.low %v1036_v18, %v1043_v11 }
 0x438   : > { %v766_v35 = vrot.slane %v743_v46, %v3905_v22  ;;  %v899_v38 = vcombine.low %v815_v23, %v822_v24  ;;  %v2775_v39 = vcombine.high %v815_v23, %v822_v24  ;;  %v2779_v42 = vcombine.high %v1036_v18, %v1043_v11 }
 0x439   : > { %v858_v36 = vrot.slane %v851_v29, %v3898_v14  ;;  %v866_v37 = vrot.slane %v2773_v30, %v3898_v14  ;;  %v1146_v40 = vpack.i.b16 %v1095_v32, %v1071_v31  ;;  %v1127_v41 = vrot.slane %v1120_v34, %v3898_v14 }
 0x43a   : > { %v843_v43 = vcombine.low %v834_v27, %v842_v28  ;;  %v875_v45 = vcombine.low %v766_v35, %v773_v19  ;;  %v2774_v47 = vcombine.high %v766_v35, %v773_v19  ;;  %v1112_v49 = vcombine.low %v1103_v26, %v1111_v33 }
 0x43b   : > { %v867_v44 = vcombine.low %v858_v36, %v866_v37  ;;  %v1477_v48 = vsel %vm1472_vm4, %v1146_v40, 0  ;;  %v1135_v50 = vrot.slane %v2779_v42, %v3898_v14  ;;  %v1148_v46 = vshrl.u32 %v1095_v32, 16 }
 0x43c   : > { %2869 = vmatpush3.bf16.xpose.msra.mxu0 %v1477_v48  ;;  %v1147_v52 = vshrl.u32 %v1071_v31, 16  ;;  %v906_v60 = vrot.slane %v899_v38, %v3898_v14  ;;  %v914_v61 = vrot.slane %v2775_v39, %v3898_v14  ;;  %v882_v62 = vrot.slane %v875_v45, %v3898_v14  ;;  %v1374_v31 = vld [vmem:[#allocation5] sm:$0x3] }
 0x43d   : > { %v1136_v55 = vcombine.low %v1127_v41, %v1135_v50  ;;  %v874_v56 = vrot.slane %v867_v44, %v3905_v22  ;;  %2874 = vmatprep.subr.bf16.mxu0 %v3431_v51  ;;  %v890_v63 = vrot.slane %v2774_v47, %v3898_v14  ;;  %v850_v0 = vrot.slane %v843_v43, %v3905_v22 }
 0x43e   : > { %v1119_v1 = vrot.slane %v1112_v49, %v3905_v22  ;;  %v1149_v3 = vpack.i.b16 %v1148_v46, %v1147_v52  ;;  %v915_v8 = vcombine.low %v906_v60, %v914_v61  ;;  %v3438_v29 = vmov 1966171168  }
 0x43f   : > { %v1143_v2 = vrot.slane %v1136_v55, %v3905_v22  ;;  %v925_v6 = vpack.i.b16 %v874_v56, %v850_v0  ;;  %v891_v12 = vcombine.low %v882_v62, %v890_v63  ;;  %v927_v18 = vshrl.u32 %v874_v56, 16 }
 0x440   : > { %v1523_v11 = vsel %vm1472_vm4, %v1149_v3, 0  ;;  %v1153_v13 = vshrl.u32 %v1119_v1, 16  ;;  %v922_v15 = vrot.slane %v915_v8, %v3905_v22  ;;  %v926_v20 = vshrl.u32 %v850_v0, 16 }
 0x441   : > { %v1152_v4 = vpack.i.b16 %v1143_v2, %v1119_v1  ;;  %v1154_v9 = vshrl.u32 %v1143_v2, 16  ;;  %v898_v19 = vrot.slane %v891_v12, %v3905_v22  ;;  %v1379_v30 = vunpack.c.l.s4 %v3438_v29 }
 0x442   : > { %v928_v24 = vpack.i.b16 %v927_v18, %v926_v20  ;;  %v933_v26 = vshrl.u32 %v922_v15, 16  ;;  %v1375_v32 = vsub.f32 1.0, %v1374_v31 }
 0x443   : > { %v1569_v10 = vsel %vm1472_vm4, %v1152_v4, 0  ;;  %2871 = vmatmul.mubr.msk.bf16.vlgmr.msra.gmra.mrb[4].mxu0 %vm1472_vm4, %v925_v6  ;;  %v1155_v21 = vpack.i.b16 %v1154_v9, %v1153_v13  ;;  %v931_v23 = vpack.i.b16 %v922_v15, %v898_v19  ;;  %v932_v27 = vshrl.u32 %v898_v19, 16 }
 0x444   : > { %2881 = vmatpush3.bf16.xpose.msra.mxu1 %v1569_v10  ;;  %2875 = vmatpush3.bf16.xpose.msra.mxu0 %v1523_v11  ;;  %v1380_v33 = vunpack.c.0.s8 %v1379_v30  ;;  %v1376_v34 = vmul.f32 -1e+09, %v1375_v32 }
 0x445   : > { %2876 = vmatprep.mubr.msk.bf16.mxu0 %vm3432_vm2, %v3431_v51  ;;  %2886 = vmatprep.subr.bf16.mxu0 %v3431_v51  ;;  %v1615_v25 = vsel %vm1472_vm4, %v1155_v21, 0  ;;  %v934_v28 = vpack.i.b16 %v933_v26, %v932_v27 }
 0x446   : > { %2892 = vmatprep.subr.bf16.mxu1 %v3431_v51  ;;  %v1383_v35 = vsub.s32 %v1380_v33, %v3880_v57 }
 0x448   : > { %v1384_v36 = vrot.slane %v1376_v34, %v1383_v35 }
 0x44a   : > { %v1392_v37 = vrot.slane %v1384_v36, %v1383_v35  ;;  %v1385_v39 = vcombine.high %v1384_v36, %v1384_v36 }
 0x44b   : > { %2883 = vmatmul.mubr.msk.bf16.vlgmr.msra.gmra.mrb[0].mxu1 %vm1472_vm4, %v931_v23  ;;  %2877 = vmatmul.mubr.msk.bf16.vlgmr.msra.gmra.mrb[8].mxu0 %vm1472_vm4, %v928_v24 }
 0x44c   : > { %2887 = vmatpush3.bf16.xpose.msra.mxu0 %v1615_v25  ;;  %2888 = vmatprep.mubr.msk.bf16.mxu0 %vm3432_vm2, %v3431_v51  ;;  %v1403_v38 = vrot.slane %v1392_v37, %v3883_v58  ;;  %v1399_v41 = vrot.slane %v1385_v39, %v1383_v35 }
 0x44d   : > { %2898 = vmatprep.subr.bf16.mxu0 %v3431_v51  ;;  %2894 = vmatprep.mubr.msk.bf16.mxu1 %vm3432_vm2, %v3431_v51 }
 0x44e   : > { %v1414_v40 = vrot.slane %v1403_v38, %v1383_v35  ;;  %v1407_v43 = vrot.slane %v1399_v41, %v3883_v58 }
 0x450   : > { %v1422_v42 = vrot.slane %v1414_v40, %v1383_v35  ;;  %v1436_v45 = vrot.slane %v1407_v43, %v1383_v35  ;;  %v1415_v47 = vcombine.high %v1414_v40, %v1414_v40 }
 0x452   : > { %v1455_v44 = vrot.slane %v1422_v42, %v3883_v58  ;;  %v1444_v46 = vrot.slane %v1436_v45, %v1383_v35  ;;  %v1429_v52 = vrot.slane %v1415_v47, %v1383_v35  ;;  %v1437_v63 = vcombine.high %v1436_v45, %v1436_v45 }
 0x453   : > { %2889 = vmatmul.mubr.msk.bf16.vlgmr.msra.gmra.mrb[12].mxu0 %vm1472_vm4, %v934_v28 }
 0x454   : > { %2900 = vmatprep.mubr.msk.bf16.mxu0 %vm3432_vm2, %v3431_v51  ;;  %v1463_v61 = vrot.slane %v1444_v46, %v3883_v58  ;;  %v1459_v62 = vrot.slane %v1429_v52, %v3883_v58  ;;  %v1451_v8 = vrot.slane %v1437_v63, %v1383_v35 }
 0x456   : > { %v1467_v18 = vrot.slane %v1451_v8, %v3883_v58 }
 0x516   : > { %v1513_v48 = vpop.f32.mrb[4].mxu0 }
 0x517   : > { %v1514_v49 = vadd.f32 %v1513_v48, %v1455_v44  ;;  %v2872_v50 = vpop.f32.mrb[5].mxu0 }
 0x518   : > { %v1516_v55 = vpop.f32.mrb[6].mxu0 }
 0x519   : > { %v2873_v56 = vpop.f32.mrb[7].mxu0  ;;  %v1658_v60 = vsel %vm1657_vm5, %v1514_v49, -inf }
 0x51a   : > { %1659 = vmax.xlane.f32.xlu0 %v1658_v60 }
 0x51e   : > { %v1605_v0 = vpop.f32.mrb[0].mxu1  ;;  %v1559_v1 = vpop.f32.mrb[8].mxu0 }
 0x51f   : > { %v1606_v2 = vadd.f32 %v1605_v0, %v1463_v61  ;;  %v2884_v3 = vpop.f32.mrb[1].mxu1  ;;  %v1560_v4 = vadd.f32 %v1559_v1, %v1459_v62  ;;  %v2878_v6 = vpop.f32.mrb[9].mxu0 }
 0x520   : > { %v1608_v9 = vpop.f32.mrb[2].mxu1  ;;  %v1562_v10 = vpop.f32.mrb[10].mxu0 }
 0x521   : > { %v2885_v11 = vpop.f32.mrb[3].mxu1  ;;  %v1664_v12 = vsel %vm1657_vm5, %v1606_v2, -inf  ;;  %v2879_v13 = vpop.f32.mrb[11].mxu0  ;;  %v1661_v15 = vsel %vm1657_vm5, %v1560_v4, -inf }
 0x522   : > { %1665 = vmax.xlane.f32.xlu0 %v1664_v12  ;;  %1662 = vmax.xlane.f32.xlu1 %v1661_v15 }
 0x526   : > { %v1651_v19 = vpop.f32.mrb[12].mxu0 }
 0x527   : > { %v1652_v20 = vadd.f32 %v1651_v19, %v1467_v18  ;;  %v2890_v21 = vpop.f32.mrb[13].mxu0 }
 0x528   : > { %v1654_v23 = vpop.f32.mrb[14].mxu0 }
 0x529   : > { %v2891_v24 = vpop.f32.mrb[15].mxu0  ;;  %v1667_v25 = vsel %vm1657_vm5, %v1652_v20, -inf }
 0x52a   : > { %1668 = vmax.xlane.f32.xlu0 %v1667_v25 }
 0x5a7   : > { %v1660_v26 = vpop.xlane.xlu0 %1659 }
 0x5a8   : > { %v1670_v27 = vsub.f32 %v1514_v49, %v1660_v26 }
 0x5aa   : > { %v1674_v28 = vmul.f32 1.442695, %v1670_v27 }
 0x5ac   : > { %3092 = vpow2.f32 %v1674_v28 }
 0x5af   : > { %v1663_v29 = vpop.xlane.xlu1 %1662  ;;  %v1666_v35 = vpop.xlane.xlu0 %1665 }
 0x5b0   : > { %v1671_v30 = vsub.f32 %v1560_v4, %v1663_v29  ;;  %v1672_v36 = vsub.f32 %v1606_v2, %v1666_v35 }
 0x5b2   : > { %v1676_v31 = vmul.f32 1.442695, %v1671_v30  ;;  %v1678_v37 = vmul.f32 1.442695, %v1672_v36 }
 0x5b4   : > { %3094 = vpow2.f32 %v1676_v31 }
 0x5b5   : > { %3096 = vpow2.f32 %v1678_v37 }
 0x5b6   : > { %v3998_v32 = vpop.eup %3092 }
 0x5b7   : > { %v1682_v58 = vsel %vm1657_vm5, %v3998_v32, 0.0  ;;  %v1669_v38 = vpop.xlane.xlu0 %1668 }
 0x5b8   : > { %1683 = vadd.xlane.f32.xlu1 %v1682_v58  ;;  %v1673_v39 = vsub.f32 %v1652_v20, %v1669_v38 }
 0x5ba   : > { %v1680_v40 = vmul.f32 1.442695, %v1673_v39 }
 0x5bc   : > { %3098 = vpow2.f32 %v1680_v40 }
 0x5be   : > { %v4002_v33 = vpop.eup %3094 }
 0x5bf   : > { %v1685_v34 = vsel %vm1657_vm5, %v4002_v33, 0.0  ;;  %v4008_v41 = vpop.eup %3096 }
 0x5c0   : > { %1686 = vadd.xlane.f32.xlu0 %v1685_v34  ;;  %v1688_v42 = vsel %vm1657_vm5, %v4008_v41, 0.0 }
 0x5c6   : > { %v4012_v43 = vpop.eup %3098 }
 0x5c9   : > { %1156 = vrot.lane.b32.xlu1 %v3890_v5, %s3439_s28  ;;  %v1691_v5 = vsel %vm1657_vm5, %v4012_v43, 0.0 }
 0x5d6   : > { %1158 = vrot.lane.b32.xlu0 %v3894_v7, %s3439_s28 }
 0x5ed   : > { %1689 = vadd.xlane.f32.xlu1 %v1688_v42 }
 0x5f5   : > { %1692 = vadd.xlane.f32.xlu0 %v1691_v5 }
 0x645   : > { %v1684_v44 = vpop.xlane.xlu1 %1683 }
 0x646   : > { %3100 = vrcp.f32 %v1684_v44 }
 0x649   : > { %v1157_v45 = vpop.permute.xlu1 %1156 }
 0x64a   : > { %v1164_v48 = vshrl.u32 %v1157_v45, 16 }
 0x64d   : > { %v1687_v7 = vpop.xlane.xlu0 %1686 }
 0x64e   : > { %3102 = vrcp.f32 %v1687_v7 }
 0x650   : > { %v3101_v34 = vpop.eup %3100 }
 0x651   : > { %v1159_v47 = vpop.permute.xlu0 %1158  ;;  %v1698_v5 = vmul.f32 %v3101_v34, %v3998_v32 }
 0x652   : > { %v1162_v49 = vpack.i.b16 %v1159_v47, %v1157_v45  ;;  %v1165_v50 = vshrl.u32 %v1159_v47, 16 }
 0x654   : > { %v1166_v46 = vpack.i.b16 %v1165_v50, %v1164_v48  ;;  %v1168_v52 = vcombine.high %v1162_v49, %v3902_v17  ;;  %v1175_v55 = vrot.slane %v1162_v49, %v3898_v14 }
 0x656   : > { %v1182_v56 = vrot.slane %v1168_v52, %v3898_v14  ;;  %v1183_v60 = vcombine.high %v1175_v55, %v3437_v16  ;;  %v1217_v61 = vcombine.high %v1166_v46, %v3902_v17  ;;  %v1224_v62 = vrot.slane %v1166_v46, %v3898_v14 }
 0x657   : > { %v1190_v63 = vrot.slane %v1175_v55, %v3905_v22 }
 0x658   : > { %v1197_v0 = vrot.slane %v1183_v60, %v3905_v22  ;;  %v1198_v1 = vcombine.high %v1182_v56, %v3437_v16  ;;  %v1231_v2 = vrot.slane %v1217_v61, %v3898_v14  ;;  %v1232_v3 = vcombine.high %v1224_v62, %v3437_v16  ;;  %v3103_v38 = vpop.eup %3102 }
 0x659   : > { %v1205_v4 = vrot.slane %v1182_v56, %v3905_v22  ;;  %v1239_v9 = vrot.slane %v1224_v62, %v3905_v22  ;;  %v1699_v47 = vmul.f32 %v3103_v38, %v4002_v33  ;;  %v1702_v56 = vpack.c.bf16 %v1698_v5, %v1698_v5 }
 0x65a   : > { %v1212_v6 = vrot.slane %v1198_v1, %v3905_v22  ;;  %v1247_v17 = vcombine.high %v1231_v2, %v3437_v16  ;;  %v1266_v8 = vcombine.low %v1190_v63, %v1197_v0  ;;  %v1246_v10 = vrot.slane %v1232_v3, %v3905_v22 }
 0x65b   : > { %v1254_v11 = vrot.slane %v1231_v2, %v3905_v22  ;;  %v2780_v12 = vcombine.high %v1190_v63, %v1197_v0  ;;  %v1703_v61 = vpack.c.bf16 %v1699_v47, %v1699_v47 }
 0x65c   : > { %v1261_v13 = vrot.slane %v1247_v17, %v3905_v22  ;;  %v1273_v15 = vrot.slane %v1266_v8, %v3898_v14  ;;  %v1314_v18 = vcombine.low %v1205_v4, %v1212_v6  ;;  %v2782_v19 = vcombine.high %v1205_v4, %v1212_v6  ;;  %v3080_v17 = vld [vmem:[%s3808_s26] sm:$0xff]  }
 0x65d   : > { %v1281_v20 = vrot.slane %v2780_v12, %v3898_v14  ;;  %v1290_v21 = vcombine.low %v1239_v9, %v1246_v10  ;;  %v2781_v23 = vcombine.high %v1239_v9, %v1246_v10 }
 0x65e   : > { %v1338_v24 = vcombine.low %v1254_v11, %v1261_v13  ;;  %v2783_v16 = vcombine.high %v1254_v11, %v1261_v13  ;;  %v1321_v25 = vrot.slane %v1314_v18, %v3898_v14  ;;  %v1329_v26 = vrot.slane %v2782_v19, %v3898_v14 }
 0x65f   : > { %v1282_v27 = vcombine.low %v1273_v15, %v1281_v20  ;;  %v1297_v28 = vrot.slane %v1290_v21, %v3898_v14  ;;  %v1305_v29 = vrot.slane %v2781_v23, %v3898_v14 }
 0x660   : > { %v1330_v30 = vcombine.low %v1321_v25, %v1329_v26  ;;  %v1345_v31 = vrot.slane %v1338_v24, %v3898_v14  ;;  %v1353_v58 = vrot.slane %v2783_v16, %v3898_v14 }
 0x661   : > { %v1289_v35 = vrot.slane %v1282_v27, %v3905_v22  ;;  %v1306_v36 = vcombine.low %v1297_v28, %v1305_v29 }
 0x662   : > { %v1354_v37 = vcombine.low %v1345_v31, %v1353_v58  ;;  %v1337_v40 = vrot.slane %v1330_v30, %v3905_v22 }
 0x663   : > { %v1313_v39 = vrot.slane %v1306_v36, %v3905_v22  ;;  %v1365_v7 = vshrl.u32 %v1289_v35, 16 }
 0x664   : > { %v1361_v42 = vrot.slane %v1354_v37, %v3905_v22  ;;  %v1371_v52 = vshrl.u32 %v1337_v40, 16 }
 0x665   : > { %v1364_v44 = vpack.i.b16 %v1313_v39, %v1289_v35  ;;  %v1366_v45 = vshrl.u32 %v1313_v39, 16 }
 0x666   : > { %v1372_v48 = vshrl.u32 %v1361_v42, 16  ;;  %v1370_v46 = vpack.i.b16 %v1361_v42, %v1337_v40 }
 0x667   : > { %v1711_v49 = vsel %vm1709_vm6, %v1364_v44, 0  ;;  %v1367_v50 = vpack.i.b16 %v1366_v45, %v1365_v7 }
 0x668   : > { %2893 = vmatpush3.bf16.msra.mxu1 %v1711_v49  ;;  %v1373_v60 = vpack.i.b16 %v1372_v48, %v1371_v52  ;;  %v1803_v32 = vsel %vm1709_vm6, %v1370_v46, 0 }
 0x669   : > { %v1757_v55 = vsel %vm1709_vm6, %v1367_v50, 0  ;;  %2904 = vmatprep.subr.bf16.mxu1 %v3431_v51 }
 0x66a   : > { %2899 = vmatpush3.bf16.msra.mxu0 %v1757_v55  ;;  %v1849_v33 = vsel %vm1709_vm6, %v1373_v60, 0 }
 0x66b   : > { %2895 = vmatmul.mubr.msk.bf16.vlgmr.msra.gmra.mrb[4].mxu1 %vm1657_vm5, %v1702_v56  ;;  %2910 = vmatprep.subr.bf16.mxu0 %v3431_v51 }
 0x66c   : > { %2905 = vmatpush3.bf16.msra.mxu1 %v1803_v32  ;;  %2906 = vmatprep.mubr.msk.bf16.mxu1 %vm3432_vm2, %v3431_v51 }
 0x66d   : > { %2901 = vmatmul.mubr.msk.bf16.vlgmr.msra.gmra.mrb[16].mxu0 %vm1657_vm5, %v1703_v61  ;;  %2916 = vmatprep.subr.bf16.mxu1 %v3431_v51 }
 0x66e   : > { %2911 = vmatpush3.bf16.msra.mxu0 %v1849_v33  ;;  %2912 = vmatprep.mubr.msk.bf16.mxu0 %vm3432_vm2, %v3431_v51 }
 0x66f   : > { %2924 = vmatprep.subr.bf16.mxu0 %v3431_v51 }
 0x67a   : > { %v1690_v62 = vpop.xlane.xlu1 %1689 }
 0x67b   : > { %3104 = vrcp.f32 %v1690_v62 }
 0x682   : > { %v1693_v63 = vpop.xlane.xlu0 %1692 }
 0x683   : > { %3106 = vrcp.f32 %v1693_v63 }
 0x685   : > { %v3105_v0 = vpop.eup %3104 }
 0x686   : > { %v1700_v1 = vmul.f32 %v3105_v0, %v4008_v41 }
 0x688   : > { %v1704_v2 = vpack.c.bf16 %v1700_v1, %v1700_v1 }
 0x68a   : > { %2907 = vmatmul.mubr.msk.bf16.vlgmr.msra.gmra.mrb[8].mxu1 %vm1657_vm5, %v1704_v2 }
 0x68b   : > { %2920 = vmatprep.mubr.msk.bf16.mxu1 %vm3432_vm2, %v3431_v51  ;;  %2917 = vmatpush3.bf16.msra.mxu1 %v3080_v17 }
 0x68c   : > { %2918 = vmatprep.subr.bf16.mxu1 %v3431_v51 }
 0x68d   : > { %v3107_v3 = vpop.eup %3106 }
 0x68e   : > { %v1701_v4 = vmul.f32 %v3107_v3, %v4012_v43 }
 0x690   : > { %v1705_v6 = vpack.c.bf16 %v1701_v4, %v1701_v4 }
 0x692   : > { %2913 = vmatmul.mubr.msk.bf16.vlgmr.msra.gmra.mrb[20].mxu0 %vm1657_vm5, %v1705_v6 }
 0x693   : > { %2928 = vmatprep.mubr.msk.bf16.mxu0 %vm3432_vm2, %v3431_v51 }
 0x73e   : > { %v1747_v41 = vpop.f32.mrb[4].mxu1 }
 0x73f   : > { %v1891_v8 = vcombine.high %v1747_v41, %v3431_v51  ;;  %v2896_v9 = vpop.f32.mrb[5].mxu1  ;;  %v1898_v12 = vrot.slane %v1747_v41, %v3898_v14 }
 0x740   : > { %v1750_v10 = vpop.f32.mrb[6].mxu1  ;;  %v1793_v11 = vpop.f32.mrb[16].mxu0 }
 0x741   : > { %v1906_v43 = vcombine.high %v1793_v11, %v3431_v51  ;;  %v1913_v13 = vrot.slane %v1793_v11, %v3898_v14  ;;  %v2897_v15 = vpop.f32.mrb[7].mxu1  ;;  %v2902_v18 = vpop.f32.mrb[17].mxu0  ;;  %v1905_v20 = vrot.slane %v1891_v8, %v3898_v14 }
 0x742   : > { %v1796_v19 = vpop.f32.mrb[18].mxu0 }
 0x743   : > { %v1920_v21 = vrot.slane %v1906_v43, %v3898_v14  ;;  %v1921_v23 = vcombine.low %v1898_v12, %v1913_v13  ;;  %v1922_v24 = vcombine.high %v1898_v12, %v1913_v13  ;;  %v2903_v16 = vpop.f32.mrb[19].mxu0  ;;  %v3081_v19 = vld [vmem:[%s3808_s26 + $0x8] sm:$0xff]  }
 0x744   : > { %2919 = vmatpush3.bf16.msra.mxu1 %v3081_v19  ;;  %v3089_v19 = vld [vmem:[%s3810_s27 + $0x28] sm:$0xff]  }
 0x745   : > { %v1929_v25 = vrot.slane %v1921_v23, %v3905_v22  ;;  %v1936_v26 = vrot.slane %v1922_v24, %v3905_v22  ;;  %v1937_v27 = vcombine.low %v1905_v20, %v1920_v21  ;;  %v1938_v28 = vcombine.high %v1905_v20, %v1920_v21  ;;  %2932 = vmatprep.subr.bf16.mxu1 %v3431_v51 }
 0x747   : > { %v1945_v29 = vrot.slane %v1937_v27, %v3905_v22  ;;  %v1952_v30 = vrot.slane %v1938_v28, %v3905_v22  ;;  %v2023_v31 = vcombine.low %v1929_v25, %v1936_v26  ;;  %v2792_v58 = vcombine.high %v1929_v25, %v1936_v26 }
 0x749   : > { %v2030_v34 = vrot.slane %v2023_v31, %v3898_v14  ;;  %v2038_v35 = vrot.slane %v2792_v58, %v3898_v14  ;;  %v2039_v36 = vcombine.low %v1945_v29, %v1952_v30  ;;  %v2793_v37 = vcombine.high %v1945_v29, %v1952_v30 }
 0x74b   : > { %v2046_v38 = vrot.slane %v2039_v36, %v3898_v14  ;;  %v2054_v39 = vrot.slane %v2793_v37, %v3898_v14  ;;  %v2055_v40 = vcombine.low %v2030_v34, %v2038_v35 }
 0x74d   : > { %v2063_v42 = vcombine.low %v2046_v38, %v2054_v39  ;;  %v2062_v5 = vrot.slane %v2055_v40, %v3905_v22 }
 0x74f   : > { %v2070_v44 = vrot.slane %v2063_v42, %v3905_v22 }
 0x751   : > { %v2071_v7 = vcombine.low %v2062_v5, %v2070_v44  ;;  %v2072_v45 = vcombine.high %v2062_v5, %v2070_v44 }
 0x75d   : > { %v1839_v47 = vpop.f32.mrb[8].mxu1 }
 0x75e   : > { %v2908_v48 = vpop.f32.mrb[9].mxu1  ;;  %v1957_v46 = vcombine.high %v1839_v47, %v3431_v51  ;;  %v1964_v55 = vrot.slane %v1839_v47, %v3898_v14 }
 0x75f   : > { %v1842_v49 = vpop.f32.mrb[10].mxu1 }
 0x760   : > { %v2909_v50 = vpop.f32.mrb[11].mxu1  ;;  %v1971_v33 = vrot.slane %v1957_v46, %v3898_v14 }
 0x765   : > { %v1885_v52 = vpop.f32.mrb[20].mxu0 }
 0x766   : > { %v1972_v56 = vcombine.high %v1885_v52, %v3431_v51  ;;  %v1979_v60 = vrot.slane %v1885_v52, %v3898_v14  ;;  %v2914_v32 = vpop.f32.mrb[21].mxu0 }
 0x767   : > { %v1888_v61 = vpop.f32.mrb[22].mxu0 }
 0x768   : > { %v1986_v62 = vrot.slane %v1972_v56, %v3898_v14  ;;  %v1987_v63 = vcombine.low %v1964_v55, %v1979_v60  ;;  %v1988_v0 = vcombine.high %v1964_v55, %v1979_v60  ;;  %v2915_v1 = vpop.f32.mrb[23].mxu0  ;;  %v3083_v55 = vld [vmem:[%s3821_s2 + $0x8] sm:$0xff]  }
 0x76a   : > { %v1995_v2 = vrot.slane %v1987_v63, %v3905_v22  ;;  %v2002_v3 = vrot.slane %v1988_v0, %v3905_v22  ;;  %v2003_v4 = vcombine.low %v1971_v33, %v1986_v62  ;;  %v2004_v6 = vcombine.high %v1971_v33, %v1986_v62 }
 0x76b   : > { %v2229_v63 = vsub.s32 2, %v3880_v57 }
 0x76c   : > { %v2011_v17 = vrot.slane %v2003_v4, %v3905_v22  ;;  %v2018_v41 = vrot.slane %v2004_v6, %v3905_v22  ;;  %v2073_v8 = vcombine.low %v1995_v2, %v2002_v3  ;;  %v2794_v9 = vcombine.high %v1995_v2, %v2002_v3 }
 0x76d   : > { %v2230_v1 = vrot.slane %v3886_v59, %v2229_v63  ;;  %v2235_v3 = vsub.s32 3, %v3880_v57 }
 0x76e   : > { %v2080_v10 = vrot.slane %v2073_v8, %v3898_v14  ;;  %v2088_v11 = vrot.slane %v2794_v9, %v3898_v14  ;;  %v2089_v12 = vcombine.low %v2011_v17, %v2018_v41  ;;  %v2795_v43 = vcombine.high %v2011_v17, %v2018_v41 }
 0x76f   : > { %v2236_v41 = vrot.slane %v3886_v59, %v2235_v3 }
 0x770   : > { %v2096_v13 = vrot.slane %v2089_v12, %v3898_v14  ;;  %v2104_v15 = vrot.slane %v2795_v43, %v3898_v14  ;;  %v2105_v18 = vcombine.low %v2080_v10, %v2088_v11  ;;  %v3084_v12 = vld [vmem:[%s3810_s27] sm:$0xff]   ;;  %v3085_v43 = vld [vmem:[%s3810_s27 + $0x8] sm:$0xff]  }
 0x772   : > { %v2113_v20 = vcombine.low %v2096_v13, %v2104_v15  ;;  %v2112_v21 = vrot.slane %v2105_v18, %v3905_v22  ;;  %v3086_v13 = vld [vmem:[%s3810_s27 + $0x10] sm:$0xff]   ;;  %v3087_v15 = vld [vmem:[%s3810_s27 + $0x18] sm:$0xff]   ;;  %v3088_v18 = vld [vmem:[%s3810_s27 + $0x20] sm:$0xff]  }
 0x774   : > { %v2120_v23 = vrot.slane %v2113_v20, %v3905_v22  ;;  %v2140_v22 = vsub.s32 1, %v3880_v57  ;;  %v3090_v20 = vld [vmem:[%s3810_s27 + $0x30] sm:$0xff]  }
 0x776   : > { %v2122_v24 = vcombine.high %v2112_v21, %v2120_v23  ;;  %v2121_v16 = vcombine.low %v2112_v21, %v2120_v23  ;;  %v2141_v31 = vrot.slane %v3886_v59, %v2140_v22  ;;  %v3091_v21 = vld [vmem:[%s3810_s27 + $0x38] sm:$0xff]   ;;  %v2246_v23 = vsub.s32 4, %v3880_v57 }
 0x778   : > { %v3073_v25 = vpack.i.bf16 %v2122_v24, %v2072_v45  ;;  %v2247_v24 = vrot.slane %v3886_v59, %v2246_v23 }
 0x77a   : > { %3074 = vrot.lane.b32.xlu1 %v3073_v25, %s3440_s29 }
 0x7ec   : > { %v3075_v26 = vpop.permute.xlu1 %3074 }
 0x7ed   : > { %v3077_v27 = vunpack.i.h.bf16 %v3075_v26  ;;  %v3076_v28 = vunpack.i.l.bf16 %v3075_v26 }
 0x7ef   : > { %v2131_v14 = vsel %vm1472_vm4, %v2071_v7, %v3076_v28  ;;  %v2132_v29 = vsel %vm1472_vm4, %v2121_v16, %v3077_v27 }
 0x7f0   : > { %v2133_v30 = vpack.c.bf16 %v2132_v29, %v2131_v14 }
 0x7f2   : > { %2921 = vmatmul.mubr.msk.bf16.vlgmr.msra.gmra.mrb[12].mxu1 %vm663_vm3, %v2133_v30 }
 0x7f3   : > { %2948 = vmatprep.mubr.msk.bf16.mxu1 %vm3432_vm2, %v3431_v51  ;;  %2933 = vmatpush3.bf16.msra.mxu1 %v3084_v12 }
 0x7f4   : > { %2934 = vmatprep.subr.bf16.mxu1 %v3431_v51 }
 0x7f7   : > { %2935 = vmatpush3.bf16.msra.mxu1 %v3085_v43  ;;  %v2462_v43 = vsub.s32 6, %v3880_v57 }
 0x7f8   : > { %2936 = vmatprep.subr.bf16.mxu1 %v3431_v51 }
 0x7fb   : > { %2937 = vmatpush3.bf16.msra.mxu1 %v3086_v13  ;;  %v2468_v13 = vsub.s32 7, %v3880_v57 }
 0x7fc   : > { %2938 = vmatprep.subr.bf16.mxu1 %v3431_v51 }
 0x7ff   : > { %2939 = vmatpush3.bf16.msra.mxu1 %v3087_v15 }
 0x800   : > { %2940 = vmatprep.subr.bf16.mxu1 %v3431_v51 }
 0x803   : > { %2941 = vmatpush3.bf16.msra.mxu1 %v3088_v18 }
 0x804   : > { %2942 = vmatprep.subr.bf16.mxu1 %v3431_v51 }
 0x807   : > { %2943 = vmatpush3.bf16.msra.mxu1 %v3089_v19 }
 0x808   : > { %2944 = vmatprep.subr.bf16.mxu1 %v3431_v51 }
 0x80b   : > { %2945 = vmatpush3.bf16.msra.mxu1 %v3090_v20 }
 0x80c   : > { %2946 = vmatprep.subr.bf16.mxu1 %v3431_v51 }
 0x80f   : > { %2947 = vmatpush3.bf16.msra.mxu1 %v3091_v21 }
 0x8c5   : > { %v2191_v58 = vpop.f32.mrb[12].mxu1 }
 0x8c6   : > { %v2192_v34 = vadd.f32 %v2191_v58, %v2141_v31  ;;  %v2922_v35 = vpop.f32.mrb[13].mxu1 }
 0x8c7   : > { %v2194_v36 = vpop.f32.mrb[14].mxu1 }
 0x8c8   : > { %v2195_v37 = vadd.f32 %v2194_v36, %v2141_v31  ;;  %v2923_v38 = vpop.f32.mrb[15].mxu1  ;;  %v2198_v39 = vadd.f32 %v2192_v34, %v3867_v53 }
 0x8ca   : > { %v2200_v40 = vsel %vm663_vm3, %v2198_v39, 0.0  ;;  %v2199_v42 = vadd.f32 %v2195_v37, %v3869_v54  ;;  %v3082_v54 = vld [vmem:[%s3821_s2] sm:$0xff]   ;;  %s4282_s2 = sld [smem:[#allocation33_spill]] (!%p2810_p13) }
 0x8cb   : > { %2201 = vadd.xlane.f32.xlu0 %v2200_v40  ;;  %2925 = vmatpush3.bf16.msra.mxu0 %v3082_v54 }
 0x8cc   : > { %v2203_v5 = vsel %vm663_vm3, %v2199_v42, 0.0  ;;  %2926 = vmatprep.subr.bf16.mxu0 %v3431_v51 }
 0x8cf   : > { %2204 = vadd.xlane.f32.xlu0 %v2203_v5  ;;  %2927 = vmatpush3.bf16.msra.mxu0 %v3083_v55 }
 0x958   : > { %v2202_v44 = vpop.xlane.xlu0 %2201 }
 0x959   : > { %v2207_v7 = vmul.f32 0.03125, %v2202_v44 }
 0x95b   : > { %v2209_v45 = vsub.f32 %v2198_v39, %v2207_v7 }
 0x95c   : > { %v2205_v47 = vpop.xlane.xlu0 %2204 }
 0x95d   : > { %v2208_v48 = vmul.f32 0.03125, %v2205_v47  ;;  %v2211_v49 = vmul.f32 %v2209_v45, %v2209_v45  ;;  %v2341_v47 = vsub.s32 5, %v3880_v57  ;;  %v3121_v57 = vld [vmem:[%s4282_s2] sm:$0xff] (!%p2810_p13)  }
 0x95f   : > { %v2210_v50 = vsub.f32 %v2199_v42, %v2208_v48  ;;  %v2213_v46 = vsel %vm663_vm3, %v2211_v49, 0.0  ;;  %v3120_v48 = vld [vmem:[%s3823_s20] sm:$0xff] }
 0x960   : > { %2214 = vadd.xlane.f32.xlu0 %v2213_v46  ;;  %v2342_v49 = vrot.slane %v3120_v48, %v2341_v47  ;;  %v2463_v15 = vrot.slane %v3120_v48, %v2462_v43  ;;  %v2469_v19 = vrot.slane %v3120_v48, %v2468_v13 }
 0x961   : > { %v2212_v53 = vmul.f32 %v2210_v50, %v2210_v50 }
 0x963   : > { %v2216_v52 = vsel %vm663_vm3, %v2212_v53, 0.0 }
 0x964   : > { %2217 = vadd.xlane.f32.xlu0 %v2216_v52 }
 0x9ed   : > { %v2215_v56 = vpop.xlane.xlu0 %2214 }
 0x9ee   : > { %v2219_v60 = vmul.f32 0.03125, %v2215_v56 }
 0x9f0   : > { %v2221_v32 = vadd.f32 1e-12, %v2219_v60 }
 0x9f1   : > { %v2218_v61 = vpop.xlane.xlu0 %2217 }
 0x9f2   : > { %3108 = vrsqrt.f32 %v2221_v32  ;;  %v2220_v33 = vmul.f32 0.03125, %v2218_v61 }
 0x9f4   : > { %v2222_v62 = vadd.f32 1e-12, %v2220_v33 }
 0x9f6   : > { %3110 = vrsqrt.f32 %v2222_v62 }
 0x9fc   : > { %v3109_v0 = vpop.eup %3108 }
 0x9fd   : > { %v2225_v2 = vmul.f32 %v3109_v0, %v2209_v45 }
 0x9ff   : > { %v2231_v6 = vmul.f32 %v2230_v1, %v2225_v2 }
 0xa00   : > { %v3111_v4 = vpop.eup %3110 }
 0xa01   : > { %v2226_v17 = vmul.f32 %v3111_v4, %v2210_v50  ;;  %v4126_v9 = vadd.f32 %v2236_v41, %v2231_v6 }
 0xa03   : > { %v2232_v8 = vmul.f32 %v2230_v1, %v2226_v17 }
 0xa05   : > { %v4128_v10 = vadd.f32 %v2236_v41, %v2232_v8 }
 0xa07   : > { %v2239_v11 = vpack.c.bf16 %v4128_v10, %v4126_v9 }
 0xa09   : > { %2929 = vmatmul.mubr.msk.bf16.vlgmr.msra.gmra.mrb[24].mxu0 %vm663_vm3, %v2239_v11 }
 0xadc   : > { %v2297_v16 = vpop.f32.mrb[24].mxu0 }
 0xadd   : > { %v2298_v25 = vadd.f32 %v2297_v16, %v2247_v24  ;;  %v2930_v26 = vpop.f32.mrb[25].mxu0 }
 0xade   : > { %v2300_v27 = vpop.f32.mrb[26].mxu0 }
 0xadf   : > { %v2306_v28 = vmul.f32 0.044715, %v2298_v25  ;;  %v2301_v14 = vadd.f32 %v2300_v27, %v2247_v24  ;;  %v2931_v29 = vpop.f32.mrb[27].mxu0  ;;  %v2304_v40 = vmul.f32 0.5, %v2298_v25  ;;  %v3441_v27 = vmov (!%p2810_p13), 0.0  }
 0xae0   : > { %2952 = vmatprep.subr.bf16.mxu0 (!%p2810_p13), %v3441_v27  ;;  %2956 = vmatprep.mubr.msk.bf16.mxu0 (!%p2810_p13), %vm3442_vm7, %v3441_v27 }
 0xae1   : > { %v2308_v30 = vmul.f32 %v2306_v28, %v2298_v25  ;;  %v2307_v22 = vmul.f32 0.044715, %v2301_v14  ;;  %v2305_v42 = vmul.f32 0.5, %v2301_v14  ;;  %2953 = vmatpush3.bf16.msra.mxu0 (!%p2810_p13), %v3121_v57  ;;  %v3122_v28 = vld [vmem:[%s4282_s2 + $0x8] sm:$0xff] (!%p2810_p13)  }
 0xae2   : > { %2954 = vmatprep.subr.bf16.mxu0 (!%p2810_p13), %v3441_v27 }
 0xae3   : > { %v2310_v31 = vmul.f32 %v2308_v30, %v2298_v25  ;;  %v2309_v58 = vmul.f32 %v2307_v22, %v2301_v14  ;;  %v2811_v30 = vld [vmem:[#allocation10 + $0x12] ss:$0 sm:$0xff] (!%p2810_p13) }
 0xae5   : > { %v2312_v34 = vadd.f32 %v2310_v31, %v2298_v25  ;;  %v2311_v35 = vmul.f32 %v2309_v58, %v2301_v14  ;;  %2955 = vmatpush3.bf16.msra.mxu0 (!%p2810_p13), %v3122_v28 }
 0xae7   : > { %v2314_v36 = vmul.f32 0.7978846, %v2312_v34  ;;  %v2313_v51 = vadd.f32 %v2311_v35, %v2301_v14 }
 0xae9   : > { %3112 = vtanh.f32 %v2314_v36  ;;  %v2315_v37 = vmul.f32 0.7978846, %v2313_v51 }
 0xaeb   : > { %3114 = vtanh.f32 %v2315_v37 }
 0xaf3   : > { %v3113_v59 = vpop.eup %3112 }
 0xaf4   : > { %v2318_v38 = vadd.f32 1.0, %v3113_v59 }
 0xaf5   : > { %v3115_v39 = vpop.eup %3114 }
 0xaf6   : > { %v2319_v5 = vadd.f32 1.0, %v3115_v39  ;;  %v2320_v44 = vmul.f32 %v2318_v38, %v2304_v40 }
 0xaf8   : > { %v2321_v7 = vmul.f32 %v2319_v5, %v2305_v42 }
 0xafa   : > { %v2322_v45 = vpack.c.bf16 %v2321_v7, %v2320_v44 }
 0xafc   : > { %2949 = vmatmul.mubr.bf16.vlgmr.msra.gmra.mrb[16].mxu1 %v2322_v45 }
 0xbcf   : > { %v2425_v50 = vpop.f32.mrb[16].mxu1 }
 0xbd0   : > { %v2426_v46 = vadd.f32 %v2425_v50, %v2342_v49  ;;  %v2950_v53 = vpop.f32.mrb[17].mxu1 }
 0xbd1   : > { %v2428_v52 = vpop.f32.mrb[18].mxu1 }
 0xbd2   : > { %v2429_v54 = vadd.f32 %v2428_v52, %v2342_v49  ;;  %v2951_v55 = vpop.f32.mrb[19].mxu1  ;;  %v2432_v56 = vadd.f32 %v2426_v46, %v4126_v9 }
 0xbd4   : > { %v2434_v60 = vsel %vm663_vm3, %v2432_v56, 0.0  ;;  %v2433_v32 = vadd.f32 %v2429_v54, %v4128_v10 }
 0xbd5   : > { %2435 = vadd.xlane.f32.xlu1 %v2434_v60 }
 0xbd6   : > { %v2437_v61 = vsel %vm663_vm3, %v2433_v32, 0.0 }
 0xbd7   : > { %2438 = vadd.xlane.f32.xlu0 %v2437_v61 }
 0xc62   : > { %v2436_v33 = vpop.xlane.xlu1 %2435 }
 0xc63   : > { %v2440_v62 = vmul.f32 0.03125, %v2436_v33 }
 0xc64   : > { %v2439_v63 = vpop.xlane.xlu0 %2438 }
 0xc65   : > { %v2442_v0 = vsub.f32 %v2432_v56, %v2440_v62  ;;  %v2441_v1 = vmul.f32 0.03125, %v2439_v63 }
 0xc67   : > { %v2443_v2 = vsub.f32 %v2433_v32, %v2441_v1  ;;  %v2444_v3 = vmul.f32 %v2442_v0, %v2442_v0 }
 0xc69   : > { %v2446_v4 = vsel %vm663_vm3, %v2444_v3, 0.0  ;;  %v2445_v6 = vmul.f32 %v2443_v2, %v2443_v2 }
 0xc6a   : > { %2447 = vadd.xlane.f32.xlu0 %v2446_v4 }
 0xc6b   : > { %v2449_v17 = vsel %vm663_vm3, %v2445_v6, 0.0 }
 0xc6e   : > { %2450 = vadd.xlane.f32.xlu0 %v2449_v17 }
 0xcf7   : > { %v2448_v41 = vpop.xlane.xlu0 %2447 }
 0xcf8   : > { %v2452_v8 = vmul.f32 0.03125, %v2448_v41 }
 0xcfa   : > { %v2454_v9 = vadd.f32 1e-12, %v2452_v8 }
 0xcfb   : > { %v2451_v10 = vpop.xlane.xlu0 %2450 }
 0xcfc   : > { %3116 = vrsqrt.f32 %v2454_v9  ;;  %v2453_v11 = vmul.f32 0.03125, %v2451_v10 }
 0xcfe   : > { %v2455_v12 = vadd.f32 1e-12, %v2453_v11 }
 0xd00   : > { %3118 = vrsqrt.f32 %v2455_v12 }
 0xd06   : > { %v3117_v18 = vpop.eup %3116 }
 0xd07   : > { %v2458_v20 = vmul.f32 %v3117_v18, %v2442_v0 }
 0xd09   : > { %v2464_v21 = vmul.f32 %v2463_v15, %v2458_v20 }
 0xd0a   : > { %v3119_v23 = vpop.eup %3118 }
 0xd0b   : > { %v2470_v24 = vadd.f32 %v2469_v19, %v2464_v21  ;;  %v2459_v16 = vmul.f32 %v3119_v23, %v2443_v2  ;;  %2477 = sbr.rel (%p2810_p13) target bundleno = 3570 (0xdf2), region = 92 }
 0xd0d   : > { %2472 = vst.msk [vmem:[#allocation2] sm:$0xff] %vm663_vm3, %v2470_v24  ;;  %v2465_v25 = vmul.f32 %v2463_v15, %v2459_v16 }
 0xd0f   : > { %v2471_v26 = vadd.f32 %v2469_v19, %v2465_v25 }
 0xd11   : > { %2473 = vst.msk [vmem:[#allocation2 + $0x8] sm:$0xff] %vm663_vm3, %v2471_v26 }
 0xd18   : > { %v2478_v14 = vld [vmem:[#allocation2] ss:$8 sm:$0x3] }
 0xd19   : > { %v2479_v29 = vpack.c.bf16 %v2478_v14, %v2478_v14 }
 0xd1b   : > { %2957 = vmatmul.mubr.msk.bf16.vlgmr.msra.gmra.mrb[0].mxu0 %vm663_vm3, %v2479_v29 }
 0xdee   : > { %v2538_v22 = vpop.f32.mrb[0].mxu0 }
 0xdef   : > { %v2539_v31 = vadd.f32 %v2811_v30, %v2538_v22  ;;  %v2958_v58 = vpop.f32.mrb[1].mxu0 }
 0xdf0   : > { %v2541_v34 = vpop.f32.mrb[2].mxu0 }
 0xdf1   : > { %2544 = vst [vmem:[#allocation17] sm:$0x3] %v2539_v31  ;;  %v2959_v35 = vpop.f32.mrb[3].mxu0 }
 0xdf2 PF: > { %p3014_p1 = scmp.eq.s32.totalorder %s3521_s21, 1  ;;  %s3443_s25 = smov [#allocation17]  }
 0xdf3   : > { %s2552_s30 = sshll.u32 %s3443_s25, 4  ;;  %s2553_s30 = int_to_ptr.vmem [resolvable:$true] %s2552_s30 }
 0xdf4   : > { %s3339_s18 = scalar_lea.vmem %s2553_s30, 32  ;;  %p3346_p8 = scmp.lt.s32.totalorder %s2553_s30, %s2553_s30 }
 0xdf5   : > { %p3340_p0 = scmp.ne.s32.totalorder %s2553_s30, %s3339_s18  ;;  %p3347_p7 = scmp.lt.s32.totalorder %s3339_s18, %s3339_s18 }
 0xdf7   : > { %p3341_p4 = pnand %p3340_p0, %p3014_p1  ;;  %p3348_p9 = por %p3347_p7, %p3346_p8 }
 0xdf9   : > { %p3342_p3 = pneg %p3341_p4 }
 0xdfb   : > { %p3349_p5 = pnand %p3348_p9, %p3342_p3 }
 0xdfd   : > { %3352 = shalt.err (!%p3349_p5)
}
 0xdfe   : > { %s4283_s16 = sld [smem:[#allocation34_spill]] }
 0xe04   : > { %s3353_s12 = scalar_lea.hbm %s4283_s16, 32 }
 0xe05   : > { %p3354_p6 = scmp.ne.s32.totalorder %s4283_s16, %s3353_s12  ;;  %p3359_p12 = scmp.lt.u32.totalorder %s3353_s12, %s4283_s16 }
 0xe07   : > { %p3355_p10 = pnand %p3354_p6, %p3014_p1 }
 0xe09   : > { %p3356_p11 = pneg %p3355_p10 }
 0xe0b   : > { %p3361_p2 = pnand %p3359_p12, %p3356_p11 }
 0xe0d   : > { %3364 = shalt.err (!%p3361_p2)
}
 0xe0e   : > { %2981 = dma.vmem_to_hbm [thread:$0]  (%p3014_p1), %s2553_s30, 32, %s4283_s16, [#allocation7]  }
 0xe0f   : > { %3400 = dma.done.wait (%p3014_p1), [#allocation7], 32  }
 0xe10   : > { %3402 = vsyncadd (%p3014_p1), [#allocation7], 4294967264 }
 0xe11 PF: > { %s4284_s20 = sld [smem:[#allocation26_spill]]  ;;  %s4285_s0 = sld [smem:[#allocation24_spill]] }
 0xe12   : > { %s4286_s18 = sld [smem:[#allocation25_spill]]  ;;  %s4287_s19 = sld [smem:[#allocation27_spill]] }
 0xe17   : > { %p32_p13 = scmp.ge.s32.totalorder %s4284_s20, 4  }
 0xe19   :  { %34 = sbr.rel (!%p32_p13) target bundleno = 25 (0x19), region = 168 }
 0xe20   :  { %2565 = vsyncpa [#allocation6], 1 }
 0xe21   :  { %2567 = vsyncpa [#allocation6 + $0x1], 1 }
 0xe22   :  { %2568 = vsyncpa [#allocation9], 1 }
 0xe23   :  { %2569 = vsyncpa [#allocation12], 1 }
 0xe24   :  { %2571 = vsyncpa [#allocation12 + $0x1], 1 }
 0xe25   :  { %2572 = vsyncpa [#allocation15], 1 }
 0xe26   :  { %2574 = vsyncpa [#allocation15 + $0x1], 1 }
 0xe27   :  { %2575 = vsyncpa [#allocation7], 1 }
 0xe28   :  { %2577 = vsyncpa [#allocation7 + $0x1], 1 }

</bundles_post_ra>
